<compile_context>
chip_gen: v5e
topology: v5e:2x2
jax: 0.10.0
libtpu: 0.0.40
codegen_flags: <defaults>
</compile_context>

<pallas_src>
import jax
import jax.numpy as jnp
from jax.experimental import pallas as pl
from jax.experimental.pallas import tpu as pltpu

F32 = jnp.float32
BF16 = jnp.bfloat16


def attack_kernel(small_ref, taps_ref, scal_ref,
                  wS_ref, bS_ref,
                  gw1_ref, gb1_ref, gw2_ref, gb2_ref,
                  wS2_ref, gw3p_ref, eb1p_ref,
                  ew2_ref, eb2_ref, ew3_ref, eb3_ref, ew4_ref, eb4_ref,
                  o_ref):
    def mm(a, w_ref):
        return jnp.dot(a.astype(BF16), w_ref[...], preferred_element_type=F32)

    # Output / Loss / Label front-ends fused into one block-diagonal matmul.
    h_small = jnp.maximum(mm(small_ref[...], wS_ref) + bS_ref[...], 0.0)  # (TB,384)

    # Conv2d(1,1,5,pad=2): BN(eval)+bias folded into the 25 tap weights (SMEM).
    acc = taps_ref[0] * scal_ref[0]                         # (4, TB, total) f32
    for k in range(1, 25):
        acc = acc + taps_ref[k] * scal_ref[k]
    # MaxPool2d(2) first (elementwise max of the 4 pool-position slabs), then
    # the folded shift + ReLU on the pooled (TB, total) tensor (exact reorder).
    pooled = jnp.maximum(jnp.maximum(acc[0], acc[1]),
                         jnp.maximum(acc[2], acc[3]))
    pooled = jnp.maximum(pooled + scal_ref[25], 0.0)        # (TB, total)

    h = jnp.maximum(mm(pooled, gw1_ref) + gb1_ref[...], 0.0)   # (TB, 256)
    h = jnp.maximum(mm(h, gw2_ref) + gb2_ref[...], 0.0)        # (TB, 128)

    # Encoder layer 1 with the component output layers folded in (concat gone).
    e = jnp.maximum(mm(h_small, wS2_ref) + mm(h, gw3p_ref) + eb1p_ref[...], 0.0)
    e = jnp.maximum(mm(e, ew2_ref) + eb2_ref[...], 0.0)        # (TB, 128)
    e = jnp.maximum(mm(e, ew3_ref) + eb3_ref[...], 0.0)        # (TB, 64)
    o_ref[...] = mm(e, ew4_ref) + eb4_ref[...]                 # (TB, 2)


def whitebox_attack_forward(params, output, loss, gradient, label):
    B, C, H, W = gradient.shape
    assert C == 1 and H % 2 == 0 and W % 2 == 0
    class_num = output.shape[1]
    total = (H // 2) * (W // 2)

    # Batch tile: sublane-aligned, capped at 128 (fits v7x default scoped VMEM;
    # on v6e this could be raised to 256 with vmem_limit_bytes).
    TB = min(128, -(-B // 8) * 8)
    B_pad = -(-B // TB) * TB
    pad = B_pad - B

    outp = jnp.pad(output.astype(F32), ((0, pad), (0, 0)))
    lossp = jnp.pad(loss.astype(F32), ((0, pad), (0, 0)))
    lblp = jnp.pad(label.astype(F32), ((0, pad), (0, 0)))
    gradp = jnp.pad(gradient.astype(F32), ((0, pad), (0, 0), (0, 0), (0, 0)))

    # ---- glue: dense (25, 4, B, total) conv taps (pool-position major) ----
    g = gradp[:, 0]
    gp = jnp.pad(g, ((0, 0), (2, 2), (2, 2)))
    taps = []
    for ki in range(5):
        for kj in range(5):
            t = gp[:, ki:ki + H, kj:kj + W]                       # (B, H, W)
            t = t.reshape(B_pad, H // 2, 2, W // 2, 2)
            t = t.transpose(2, 4, 0, 1, 3).reshape(4, B_pad, total)
            taps.append(t)
    taps = jnp.stack(taps, axis=0)                                # (25,4,B,total)
    # TODO(synk): for large gradient maps, build the 25 shifted slices inside the
    # kernel (or pre-pool in glue) to avoid the 25x HBM expansion of taps.

    # ---- fold conv bias + eval BatchNorm into the 25 tap weights ----
    gamma, beta, mean, var = params['bn']
    bn_scale = gamma / jnp.sqrt(var + 1e-5)
    bn_shift = beta - mean * bn_scale
    conv_w = params['conv_w'].reshape(-1).astype(F32) * bn_scale  # (25,)
    shift = params['conv_b'] * bn_scale + bn_shift
    scal = jnp.concatenate([conv_w, shift.reshape(1)]).astype(F32)  # (26,) SMEM

    # ---- fuse Output/Loss/Label first layers (block-diagonal weight) ----
    Ks = 2 * class_num + 1
    small_x = jnp.concatenate([outp, lossp, lblp], axis=1).astype(BF16)  # (B,Ks)
    wS = jnp.zeros((Ks, 384), F32)
    wS = wS.at[0:class_num, 0:128].set(params['ow1'])
    wS = wS.at[class_num:class_num + 1, 128:256].set(params['lw1'])
    wS = wS.at[class_num + 1:, 256:384].set(params['yw1'])
    bS = jnp.concatenate([params['ob1'], params['lb1'], params['yb1']], axis=1)

    # ---- fold the 64-wide component output layers into encoder layer 1 ----
    ew1 = params['ew1']
    ow2p = params['ow2'] @ ew1[0:64, :]
    lw2p = params['lw2'] @ ew1[64:128, :]
    gw3p = params['gw3'] @ ew1[128:192, :]
    yw2p = params['yw2'] @ ew1[192:256, :]
    wS2 = jnp.concatenate([ow2p, lw2p, yw2p], axis=0)             # (384, 256)
    eb1p = (params['eb1'] + params['ob2'] @ ew1[0:64, :]
            + params['lb2'] @ ew1[64:128, :]
            + params['gb3'] @ ew1[128:192, :]
            + params['yb2'] @ ew1[192:256, :])                    # (1, 256)

    def w16(x):
        return x.astype(BF16)

    weights = (w16(wS), bS.astype(F32),
               w16(params['gw1']), params['gb1'].astype(F32),
               w16(params['gw2']), params['gb2'].astype(F32),
               w16(wS2), w16(gw3p), eb1p.astype(F32),
               w16(params['ew2']), params['eb2'].astype(F32),
               w16(params['ew3']), params['eb3'].astype(F32),
               w16(params['ew4']), params['eb4'].astype(F32))

    grid = (B_pad // TB,)
    batch_map = lambda i: (i, 0)
    taps_map = lambda i: (0, 0, i, 0)
    const2 = lambda i: (0, 0)

    in_specs = ([pl.BlockSpec((TB, Ks), batch_map),
                 pl.BlockSpec((25, 4, TB, total), taps_map),
                 pl.BlockSpec(memory_space=pltpu.MemorySpace.SMEM)]
                + [pl.BlockSpec(w.shape, const2) for w in weights])

    out = pl.pallas_call(
        attack_kernel,
        out_shape=jax.ShapeDtypeStruct((B_pad, 2), F32),
        grid=grid,
        in_specs=in_specs,
        out_specs=pl.BlockSpec((TB, 2), batch_map),
        compiler_params=pltpu.CompilerParams(
            dimension_semantics=("parallel",)),
    )(small_x, taps, scal, *weights)
    return out[:B]


def init_params(key, class_num, total):
    ks = iter(jax.random.split(key, 40))

    def w(shape, scale=0.05):
        return jax.random.normal(next(ks), shape, F32) * scale

    p = {}
    p['ow1'], p['ob1'] = w((class_num, 128)), w((1, 128))
    p['ow2'], p['ob2'] = w((128, 64)), w((1, 64))
    p['lw1'], p['lb1'] = w((1, 128)), w((1, 128))
    p['lw2'], p['lb2'] = w((128, 64)), w((1, 64))
    p['conv_w'] = w((5, 5), 0.2)
    p['conv_b'] = w((), 0.2)
    # gamma, beta, running_mean, running_var (eval-mode BatchNorm2d, 1 channel)
    p['bn'] = (jnp.float32(1.1), jnp.float32(-0.05),
               jnp.float32(0.02), jnp.float32(0.9))
    p['gw1'], p['gb1'] = w((total, 256)), w((1, 256))
    p['gw2'], p['gb2'] = w((256, 128)), w((1, 128))
    p['gw3'], p['gb3'] = w((128, 64)), w((1, 64))
    p['yw1'], p['yb1'] = w((class_num, 128)), w((1, 128))
    p['yw2'], p['yb2'] = w((128, 64)), w((1, 64))
    p['ew1'], p['eb1'] = w((256, 256)), w((1, 256))
    p['ew2'], p['eb2'] = w((256, 128)), w((1, 128))
    p['ew3'], p['eb3'] = w((128, 64)), w((1, 64))
    p['ew4'], p['eb4'] = w((64, 2)), w((1, 2))
    return p


def ref_forward(params, output, loss, gradient, label):
    """Pure-JAX reference of the eval-mode PyTorch forward."""
    def lin(x, w, b):
        return x @ w + b

    def comp2(x, w1, b1, w2, b2):
        return lin(jnp.maximum(lin(x, w1, b1), 0.0), w2, b2)

    of = comp2(output, params['ow1'], params['ob1'], params['ow2'], params['ob2'])
    lf = comp2(loss, params['lw1'], params['lb1'], params['lw2'], params['lb2'])
    yf = comp2(label, params['yw1'], params['yb1'], params['yw2'], params['yb2'])

    w = params['conv_w'].reshape(1, 1, 5, 5)
    y = jax.lax.conv_general_dilated(gradient, w, (1, 1), ((2, 2), (2, 2)),
                                     dimension_numbers=('NCHW', 'OIHW', 'NCHW'))
    y = y + params['conv_b']
    gamma, beta, mean, var = params['bn']
    y = (y - mean) / jnp.sqrt(var + 1e-5) * gamma + beta
    y = jnp.maximum(y, 0.0)
    y = jax.lax.reduce_window(y, -jnp.inf, jax.lax.max, (1, 1, 2, 2), (1, 1, 2, 2), 'VALID')
    y = y.reshape(y.shape[0], -1)
    h = jnp.maximum(lin(y, params['gw1'], params['gb1']), 0.0)
    h = jnp.maximum(lin(h, params['gw2'], params['gb2']), 0.0)
    gf = lin(h, params['gw3'], params['gb3'])

    fin = jnp.concatenate([of, lf, gf, yf], axis=1)
    e = jnp.maximum(lin(fin, params['ew1'], params['eb1']), 0.0)
    e = jnp.maximum(lin(e, params['ew2'], params['eb2']), 0.0)
    e = jnp.maximum(lin(e, params['ew3'], params['eb3']), 0.0)
    return lin(e, params['ew4'], params['eb4'])


if __name__ == "__main__":
    B, class_num, H, W = 2, 8, 16, 16
    total = (H // 2) * (W // 2)            # 64 == Flatten size after maxpool

    key = jax.random.PRNGKey(0)
    kp, ko, kl, kg, ky = jax.random.split(key, 5)
    params = init_params(kp, class_num, total)

    output = jax.random.normal(ko, (B, class_num), F32)
    loss = jax.random.normal(kl, (B, 1), F32)
    gradient = jax.random.normal(kg, (B, 1, H, W), F32)
    label = jax.nn.softmax(jax.random.normal(ky, (B, class_num), F32), axis=-1)

    out = jax.jit(whitebox_attack_forward)(params, output, loss, gradient, label)
    out = jax.block_until_ready(out)

    ref = ref_forward(params, output, loss, gradient, label)
    assert out.shape == (B, 2)
    assert jnp.allclose(out, ref, atol=2e-2, rtol=2e-2), (out, ref)
    print("KERNEL_OK")
</pallas_src>

<mosaic_0001>
module attributes {stable_mosaic.version = 11 : i64} {
  func.func @attack_kernel(%arg0: i32, %arg1: memref<8x17xbf16, #tpu.memory_space<vmem>>, %arg2: memref<25x4x8x64xf32, #tpu.memory_space<vmem>>, %arg3: memref<26xf32, #tpu.memory_space<smem>>, %arg4: memref<17x384xbf16, #tpu.memory_space<vmem>>, %arg5: memref<1x384xf32, #tpu.memory_space<vmem>>, %arg6: memref<64x256xbf16, #tpu.memory_space<vmem>>, %arg7: memref<1x256xf32, #tpu.memory_space<vmem>>, %arg8: memref<256x128xbf16, #tpu.memory_space<vmem>>, %arg9: memref<1x128xf32, #tpu.memory_space<vmem>>, %arg10: memref<384x256xbf16, #tpu.memory_space<vmem>>, %arg11: memref<128x256xbf16, #tpu.memory_space<vmem>>, %arg12: memref<1x256xf32, #tpu.memory_space<vmem>>, %arg13: memref<256x128xbf16, #tpu.memory_space<vmem>>, %arg14: memref<1x128xf32, #tpu.memory_space<vmem>>, %arg15: memref<128x64xbf16, #tpu.memory_space<vmem>>, %arg16: memref<1x64xf32, #tpu.memory_space<vmem>>, %arg17: memref<64x2xbf16, #tpu.memory_space<vmem>>, %arg18: memref<1x2xf32, #tpu.memory_space<vmem>>, %arg19: memref<8x2xf32, #tpu.memory_space<vmem>>) attributes {dimension_semantics = [#tpu.dimension_semantics<parallel>], iteration_bounds = array<i64: 1>, scalar_prefetch = 0 : i64, scratch_operands = 0 : i64, tpu.core_type = #tpu.core_type<tc>, window_params = [{transform_indices = @transform_0, window_bounds = array<i64: 8, 17>}, {transform_indices = @transform_1, window_bounds = array<i64: 25, 4, 8, 64>}, {transform_indices = @transform_2, window_bounds = array<i64: 26>}, {pipeline_mode = #tpu.pipeline_mode<synchronous>, transform_indices = @transform_3, window_bounds = array<i64: 17, 384>}, {pipeline_mode = #tpu.pipeline_mode<synchronous>, transform_indices = @transform_4, window_bounds = array<i64: 1, 384>}, {pipeline_mode = #tpu.pipeline_mode<synchronous>, transform_indices = @transform_5, window_bounds = array<i64: 64, 256>}, {pipeline_mode = #tpu.pipeline_mode<synchronous>, transform_indices = @transform_6, window_bounds = array<i64: 1, 256>}, {pipeline_mode = #tpu.pipeline_mode<synchronous>, transform_indices = @transform_7, window_bounds = array<i64: 256, 128>}, {pipeline_mode = #tpu.pipeline_mode<synchronous>, transform_indices = @transform_8, window_bounds = array<i64: 1, 128>}, {pipeline_mode = #tpu.pipeline_mode<synchronous>, transform_indices = @transform_9, window_bounds = array<i64: 384, 256>}, {pipeline_mode = #tpu.pipeline_mode<synchronous>, transform_indices = @transform_10, window_bounds = array<i64: 128, 256>}, {pipeline_mode = #tpu.pipeline_mode<synchronous>, transform_indices = @transform_11, window_bounds = array<i64: 1, 256>}, {pipeline_mode = #tpu.pipeline_mode<synchronous>, transform_indices = @transform_12, window_bounds = array<i64: 256, 128>}, {pipeline_mode = #tpu.pipeline_mode<synchronous>, transform_indices = @transform_13, window_bounds = array<i64: 1, 128>}, {pipeline_mode = #tpu.pipeline_mode<synchronous>, transform_indices = @transform_14, window_bounds = array<i64: 128, 64>}, {pipeline_mode = #tpu.pipeline_mode<synchronous>, transform_indices = @transform_15, window_bounds = array<i64: 1, 64>}, {pipeline_mode = #tpu.pipeline_mode<synchronous>, transform_indices = @transform_16, window_bounds = array<i64: 64, 2>}, {pipeline_mode = #tpu.pipeline_mode<synchronous>, transform_indices = @transform_17, window_bounds = array<i64: 1, 2>}, {transform_indices = @transform_18, window_bounds = array<i64: 8, 2>}]} {
    %c0 = arith.constant 0 : index
    %c0_0 = arith.constant 0 : index
    %0 = vector.load %arg1[%c0, %c0_0] : memref<8x17xbf16, #tpu.memory_space<vmem>>, vector<8x17xbf16>
    %c0_1 = arith.constant 0 : index
    %c0_2 = arith.constant 0 : index
    %1 = vector.load %arg4[%c0_1, %c0_2] : memref<17x384xbf16, #tpu.memory_space<vmem>>, vector<17x384xbf16>
    %cst = arith.constant dense<0.000000e+00> : vector<8x384xf32>
    %2 = tpu.matmul %0, %1, %cst {dimension_numbers = #tpu.dot_dimension_numbers<[1], [0], [0], [1], [0, 0, 1, 1], [], []>} : vector<8x17xbf16>, vector<17x384xbf16>, vector<8x384xf32> -> vector<8x384xf32>
    %c0_3 = arith.constant 0 : index
    %c0_4 = arith.constant 0 : index
    %3 = vector.load %arg5[%c0_3, %c0_4] : memref<1x384xf32, #tpu.memory_space<vmem>>, vector<1x384xf32>
    %4 = vector.broadcast %3 : vector<1x384xf32> to vector<8x384xf32>
    %5 = arith.addf %2, %4 : vector<8x384xf32>
    %cst_5 = arith.constant 0.000000e+00 : f32
    %6 = vector.broadcast %cst_5 : f32 to vector<8x384xf32>
    %7 = arith.maximumf %5, %6 : vector<8x384xf32>
    %c0_6 = arith.constant 0 : index
    %c0_7 = arith.constant 0 : index
    %c0_8 = arith.constant 0 : index
    %c0_9 = arith.constant 0 : index
    %8 = vector.load %arg2[%c0_6, %c0_7, %c0_8, %c0_9] : memref<25x4x8x64xf32, #tpu.memory_space<vmem>>, vector<1x4x8x64xf32>
    %9 = vector.shape_cast %8 : vector<1x4x8x64xf32> to vector<4x8x64xf32>
    %c0_10 = arith.constant 0 : index
    %10 = memref.load %arg3[%c0_10] : memref<26xf32, #tpu.memory_space<smem>>
    %11 = vector.broadcast %10 : f32 to vector<4x8x64xf32>
    %12 = arith.mulf %9, %11 : vector<4x8x64xf32>
    %c1 = arith.constant 1 : index
    %c0_11 = arith.constant 0 : index
    %c0_12 = arith.constant 0 : index
    %c0_13 = arith.constant 0 : index
    %13 = vector.load %arg2[%c1, %c0_11, %c0_12, %c0_13] : memref<25x4x8x64xf32, #tpu.memory_space<vmem>>, vector<1x4x8x64xf32>
    %14 = vector.shape_cast %13 : vector<1x4x8x64xf32> to vector<4x8x64xf32>
    %c1_14 = arith.constant 1 : index
    %15 = memref.load %arg3[%c1_14] : memref<26xf32, #tpu.memory_space<smem>>
    %16 = vector.broadcast %15 : f32 to vector<4x8x64xf32>
    %17 = arith.mulf %14, %16 : vector<4x8x64xf32>
    %18 = arith.addf %12, %17 : vector<4x8x64xf32>
    %c2 = arith.constant 2 : index
    %c0_15 = arith.constant 0 : index
    %c0_16 = arith.constant 0 : index
    %c0_17 = arith.constant 0 : index
    %19 = vector.load %arg2[%c2, %c0_15, %c0_16, %c0_17] : memref<25x4x8x64xf32, #tpu.memory_space<vmem>>, vector<1x4x8x64xf32>
    %20 = vector.shape_cast %19 : vector<1x4x8x64xf32> to vector<4x8x64xf32>
    %c2_18 = arith.constant 2 : index
    %21 = memref.load %arg3[%c2_18] : memref<26xf32, #tpu.memory_space<smem>>
    %22 = vector.broadcast %21 : f32 to vector<4x8x64xf32>
    %23 = arith.mulf %20, %22 : vector<4x8x64xf32>
    %24 = arith.addf %18, %23 : vector<4x8x64xf32>
    %c3 = arith.constant 3 : index
    %c0_19 = arith.constant 0 : index
    %c0_20 = arith.constant 0 : index
    %c0_21 = arith.constant 0 : index
    %25 = vector.load %arg2[%c3, %c0_19, %c0_20, %c0_21] : memref<25x4x8x64xf32, #tpu.memory_space<vmem>>, vector<1x4x8x64xf32>
    %26 = vector.shape_cast %25 : vector<1x4x8x64xf32> to vector<4x8x64xf32>
    %c3_22 = arith.constant 3 : index
    %27 = memref.load %arg3[%c3_22] : memref<26xf32, #tpu.memory_space<smem>>
    %28 = vector.broadcast %27 : f32 to vector<4x8x64xf32>
    %29 = arith.mulf %26, %28 : vector<4x8x64xf32>
    %30 = arith.addf %24, %29 : vector<4x8x64xf32>
    %c4 = arith.constant 4 : index
    %c0_23 = arith.constant 0 : index
    %c0_24 = arith.constant 0 : index
    %c0_25 = arith.constant 0 : index
    %31 = vector.load %arg2[%c4, %c0_23, %c0_24, %c0_25] : memref<25x4x8x64xf32, #tpu.memory_space<vmem>>, vector<1x4x8x64xf32>
    %32 = vector.shape_cast %31 : vector<1x4x8x64xf32> to vector<4x8x64xf32>
    %c4_26 = arith.constant 4 : index
    %33 = memref.load %arg3[%c4_26] : memref<26xf32, #tpu.memory_space<smem>>
    %34 = vector.broadcast %33 : f32 to vector<4x8x64xf32>
    %35 = arith.mulf %32, %34 : vector<4x8x64xf32>
    %36 = arith.addf %30, %35 : vector<4x8x64xf32>
    %c5 = arith.constant 5 : index
    %c0_27 = arith.constant 0 : index
    %c0_28 = arith.constant 0 : index
    %c0_29 = arith.constant 0 : index
    %37 = vector.load %arg2[%c5, %c0_27, %c0_28, %c0_29] : memref<25x4x8x64xf32, #tpu.memory_space<vmem>>, vector<1x4x8x64xf32>
    %38 = vector.shape_cast %37 : vector<1x4x8x64xf32> to vector<4x8x64xf32>
    %c5_30 = arith.constant 5 : index
    %39 = memref.load %arg3[%c5_30] : memref<26xf32, #tpu.memory_space<smem>>
    %40 = vector.broadcast %39 : f32 to vector<4x8x64xf32>
    %41 = arith.mulf %38, %40 : vector<4x8x64xf32>
    %42 = arith.addf %36, %41 : vector<4x8x64xf32>
    %c6 = arith.constant 6 : index
    %c0_31 = arith.constant 0 : index
    %c0_32 = arith.constant 0 : index
    %c0_33 = arith.constant 0 : index
    %43 = vector.load %arg2[%c6, %c0_31, %c0_32, %c0_33] : memref<25x4x8x64xf32, #tpu.memory_space<vmem>>, vector<1x4x8x64xf32>
    %44 = vector.shape_cast %43 : vector<1x4x8x64xf32> to vector<4x8x64xf32>
    %c6_34 = arith.constant 6 : index
    %45 = memref.load %arg3[%c6_34] : memref<26xf32, #tpu.memory_space<smem>>
    %46 = vector.broadcast %45 : f32 to vector<4x8x64xf32>
    %47 = arith.mulf %44, %46 : vector<4x8x64xf32>
    %48 = arith.addf %42, %47 : vector<4x8x64xf32>
    %c7 = arith.constant 7 : index
    %c0_35 = arith.constant 0 : index
    %c0_36 = arith.constant 0 : index
    %c0_37 = arith.constant 0 : index
    %49 = vector.load %arg2[%c7, %c0_35, %c0_36, %c0_37] : memref<25x4x8x64xf32, #tpu.memory_space<vmem>>, vector<1x4x8x64xf32>
    %50 = vector.shape_cast %49 : vector<1x4x8x64xf32> to vector<4x8x64xf32>
    %c7_38 = arith.constant 7 : index
    %51 = memref.load %arg3[%c7_38] : memref<26xf32, #tpu.memory_space<smem>>
    %52 = vector.broadcast %51 : f32 to vector<4x8x64xf32>
    %53 = arith.mulf %50, %52 : vector<4x8x64xf32>
    %54 = arith.addf %48, %53 : vector<4x8x64xf32>
    %c8 = arith.constant 8 : index
    %c0_39 = arith.constant 0 : index
    %c0_40 = arith.constant 0 : index
    %c0_41 = arith.constant 0 : index
    %55 = vector.load %arg2[%c8, %c0_39, %c0_40, %c0_41] : memref<25x4x8x64xf32, #tpu.memory_space<vmem>>, vector<1x4x8x64xf32>
    %56 = vector.shape_cast %55 : vector<1x4x8x64xf32> to vector<4x8x64xf32>
    %c8_42 = arith.constant 8 : index
    %57 = memref.load %arg3[%c8_42] : memref<26xf32, #tpu.memory_space<smem>>
    %58 = vector.broadcast %57 : f32 to vector<4x8x64xf32>
    %59 = arith.mulf %56, %58 : vector<4x8x64xf32>
    %60 = arith.addf %54, %59 : vector<4x8x64xf32>
    %c9 = arith.constant 9 : index
    %c0_43 = arith.constant 0 : index
    %c0_44 = arith.constant 0 : index
    %c0_45 = arith.constant 0 : index
    %61 = vector.load %arg2[%c9, %c0_43, %c0_44, %c0_45] : memref<25x4x8x64xf32, #tpu.memory_space<vmem>>, vector<1x4x8x64xf32>
    %62 = vector.shape_cast %61 : vector<1x4x8x64xf32> to vector<4x8x64xf32>
    %c9_46 = arith.constant 9 : index
    %63 = memref.load %arg3[%c9_46] : memref<26xf32, #tpu.memory_space<smem>>
    %64 = vector.broadcast %63 : f32 to vector<4x8x64xf32>
    %65 = arith.mulf %62, %64 : vector<4x8x64xf32>
    %66 = arith.addf %60, %65 : vector<4x8x64xf32>
    %c10 = arith.constant 10 : index
    %c0_47 = arith.constant 0 : index
    %c0_48 = arith.constant 0 : index
    %c0_49 = arith.constant 0 : index
    %67 = vector.load %arg2[%c10, %c0_47, %c0_48, %c0_49] : memref<25x4x8x64xf32, #tpu.memory_space<vmem>>, vector<1x4x8x64xf32>
    %68 = vector.shape_cast %67 : vector<1x4x8x64xf32> to vector<4x8x64xf32>
    %c10_50 = arith.constant 10 : index
    %69 = memref.load %arg3[%c10_50] : memref<26xf32, #tpu.memory_space<smem>>
    %70 = vector.broadcast %69 : f32 to vector<4x8x64xf32>
    %71 = arith.mulf %68, %70 : vector<4x8x64xf32>
    %72 = arith.addf %66, %71 : vector<4x8x64xf32>
    %c11 = arith.constant 11 : index
    %c0_51 = arith.constant 0 : index
    %c0_52 = arith.constant 0 : index
    %c0_53 = arith.constant 0 : index
    %73 = vector.load %arg2[%c11, %c0_51, %c0_52, %c0_53] : memref<25x4x8x64xf32, #tpu.memory_space<vmem>>, vector<1x4x8x64xf32>
    %74 = vector.shape_cast %73 : vector<1x4x8x64xf32> to vector<4x8x64xf32>
    %c11_54 = arith.constant 11 : index
    %75 = memref.load %arg3[%c11_54] : memref<26xf32, #tpu.memory_space<smem>>
    %76 = vector.broadcast %75 : f32 to vector<4x8x64xf32>
    %77 = arith.mulf %74, %76 : vector<4x8x64xf32>
    %78 = arith.addf %72, %77 : vector<4x8x64xf32>
    %c12 = arith.constant 12 : index
    %c0_55 = arith.constant 0 : index
    %c0_56 = arith.constant 0 : index
    %c0_57 = arith.constant 0 : index
    %79 = vector.load %arg2[%c12, %c0_55, %c0_56, %c0_57] : memref<25x4x8x64xf32, #tpu.memory_space<vmem>>, vector<1x4x8x64xf32>
    %80 = vector.shape_cast %79 : vector<1x4x8x64xf32> to vector<4x8x64xf32>
    %c12_58 = arith.constant 12 : index
    %81 = memref.load %arg3[%c12_58] : memref<26xf32, #tpu.memory_space<smem>>
    %82 = vector.broadcast %81 : f32 to vector<4x8x64xf32>
    %83 = arith.mulf %80, %82 : vector<4x8x64xf32>
    %84 = arith.addf %78, %83 : vector<4x8x64xf32>
    %c13 = arith.constant 13 : index
    %c0_59 = arith.constant 0 : index
    %c0_60 = arith.constant 0 : index
    %c0_61 = arith.constant 0 : index
    %85 = vector.load %arg2[%c13, %c0_59, %c0_60, %c0_61] : memref<25x4x8x64xf32, #tpu.memory_space<vmem>>, vector<1x4x8x64xf32>
    %86 = vector.shape_cast %85 : vector<1x4x8x64xf32> to vector<4x8x64xf32>
    %c13_62 = arith.constant 13 : index
    %87 = memref.load %arg3[%c13_62] : memref<26xf32, #tpu.memory_space<smem>>
    %88 = vector.broadcast %87 : f32 to vector<4x8x64xf32>
    %89 = arith.mulf %86, %88 : vector<4x8x64xf32>
    %90 = arith.addf %84, %89 : vector<4x8x64xf32>
    %c14 = arith.constant 14 : index
    %c0_63 = arith.constant 0 : index
    %c0_64 = arith.constant 0 : index
    %c0_65 = arith.constant 0 : index
    %91 = vector.load %arg2[%c14, %c0_63, %c0_64, %c0_65] : memref<25x4x8x64xf32, #tpu.memory_space<vmem>>, vector<1x4x8x64xf32>
    %92 = vector.shape_cast %91 : vector<1x4x8x64xf32> to vector<4x8x64xf32>
    %c14_66 = arith.constant 14 : index
    %93 = memref.load %arg3[%c14_66] : memref<26xf32, #tpu.memory_space<smem>>
    %94 = vector.broadcast %93 : f32 to vector<4x8x64xf32>
    %95 = arith.mulf %92, %94 : vector<4x8x64xf32>
    %96 = arith.addf %90, %95 : vector<4x8x64xf32>
    %c15 = arith.constant 15 : index
    %c0_67 = arith.constant 0 : index
    %c0_68 = arith.constant 0 : index
    %c0_69 = arith.constant 0 : index
    %97 = vector.load %arg2[%c15, %c0_67, %c0_68, %c0_69] : memref<25x4x8x64xf32, #tpu.memory_space<vmem>>, vector<1x4x8x64xf32>
    %98 = vector.shape_cast %97 : vector<1x4x8x64xf32> to vector<4x8x64xf32>
    %c15_70 = arith.constant 15 : index
    %99 = memref.load %arg3[%c15_70] : memref<26xf32, #tpu.memory_space<smem>>
    %100 = vector.broadcast %99 : f32 to vector<4x8x64xf32>
    %101 = arith.mulf %98, %100 : vector<4x8x64xf32>
    %102 = arith.addf %96, %101 : vector<4x8x64xf32>
    %c16 = arith.constant 16 : index
    %c0_71 = arith.constant 0 : index
    %c0_72 = arith.constant 0 : index
    %c0_73 = arith.constant 0 : index
    %103 = vector.load %arg2[%c16, %c0_71, %c0_72, %c0_73] : memref<25x4x8x64xf32, #tpu.memory_space<vmem>>, vector<1x4x8x64xf32>
    %104 = vector.shape_cast %103 : vector<1x4x8x64xf32> to vector<4x8x64xf32>
    %c16_74 = arith.constant 16 : index
    %105 = memref.load %arg3[%c16_74] : memref<26xf32, #tpu.memory_space<smem>>
    %106 = vector.broadcast %105 : f32 to vector<4x8x64xf32>
    %107 = arith.mulf %104, %106 : vector<4x8x64xf32>
    %108 = arith.addf %102, %107 : vector<4x8x64xf32>
    %c17 = arith.constant 17 : index
    %c0_75 = arith.constant 0 : index
    %c0_76 = arith.constant 0 : index
    %c0_77 = arith.constant 0 : index
    %109 = vector.load %arg2[%c17, %c0_75, %c0_76, %c0_77] : memref<25x4x8x64xf32, #tpu.memory_space<vmem>>, vector<1x4x8x64xf32>
    %110 = vector.shape_cast %109 : vector<1x4x8x64xf32> to vector<4x8x64xf32>
    %c17_78 = arith.constant 17 : index
    %111 = memref.load %arg3[%c17_78] : memref<26xf32, #tpu.memory_space<smem>>
    %112 = vector.broadcast %111 : f32 to vector<4x8x64xf32>
    %113 = arith.mulf %110, %112 : vector<4x8x64xf32>
    %114 = arith.addf %108, %113 : vector<4x8x64xf32>
    %c18 = arith.constant 18 : index
    %c0_79 = arith.constant 0 : index
    %c0_80 = arith.constant 0 : index
    %c0_81 = arith.constant 0 : index
    %115 = vector.load %arg2[%c18, %c0_79, %c0_80, %c0_81] : memref<25x4x8x64xf32, #tpu.memory_space<vmem>>, vector<1x4x8x64xf32>
    %116 = vector.shape_cast %115 : vector<1x4x8x64xf32> to vector<4x8x64xf32>
    %c18_82 = arith.constant 18 : index
    %117 = memref.load %arg3[%c18_82] : memref<26xf32, #tpu.memory_space<smem>>
    %118 = vector.broadcast %117 : f32 to vector<4x8x64xf32>
    %119 = arith.mulf %116, %118 : vector<4x8x64xf32>
    %120 = arith.addf %114, %119 : vector<4x8x64xf32>
    %c19 = arith.constant 19 : index
    %c0_83 = arith.constant 0 : index
    %c0_84 = arith.constant 0 : index
    %c0_85 = arith.constant 0 : index
    %121 = vector.load %arg2[%c19, %c0_83, %c0_84, %c0_85] : memref<25x4x8x64xf32, #tpu.memory_space<vmem>>, vector<1x4x8x64xf32>
    %122 = vector.shape_cast %121 : vector<1x4x8x64xf32> to vector<4x8x64xf32>
    %c19_86 = arith.constant 19 : index
    %123 = memref.load %arg3[%c19_86] : memref<26xf32, #tpu.memory_space<smem>>
    %124 = vector.broadcast %123 : f32 to vector<4x8x64xf32>
    %125 = arith.mulf %122, %124 : vector<4x8x64xf32>
    %126 = arith.addf %120, %125 : vector<4x8x64xf32>
    %c20 = arith.constant 20 : index
    %c0_87 = arith.constant 0 : index
    %c0_88 = arith.constant 0 : index
    %c0_89 = arith.constant 0 : index
    %127 = vector.load %arg2[%c20, %c0_87, %c0_88, %c0_89] : memref<25x4x8x64xf32, #tpu.memory_space<vmem>>, vector<1x4x8x64xf32>
    %128 = vector.shape_cast %127 : vector<1x4x8x64xf32> to vector<4x8x64xf32>
    %c20_90 = arith.constant 20 : index
    %129 = memref.load %arg3[%c20_90] : memref<26xf32, #tpu.memory_space<smem>>
    %130 = vector.broadcast %129 : f32 to vector<4x8x64xf32>
    %131 = arith.mulf %128, %130 : vector<4x8x64xf32>
    %132 = arith.addf %126, %131 : vector<4x8x64xf32>
    %c21 = arith.constant 21 : index
    %c0_91 = arith.constant 0 : index
    %c0_92 = arith.constant 0 : index
    %c0_93 = arith.constant 0 : index
    %133 = vector.load %arg2[%c21, %c0_91, %c0_92, %c0_93] : memref<25x4x8x64xf32, #tpu.memory_space<vmem>>, vector<1x4x8x64xf32>
    %134 = vector.shape_cast %133 : vector<1x4x8x64xf32> to vector<4x8x64xf32>
    %c21_94 = arith.constant 21 : index
    %135 = memref.load %arg3[%c21_94] : memref<26xf32, #tpu.memory_space<smem>>
    %136 = vector.broadcast %135 : f32 to vector<4x8x64xf32>
    %137 = arith.mulf %134, %136 : vector<4x8x64xf32>
    %138 = arith.addf %132, %137 : vector<4x8x64xf32>
    %c22 = arith.constant 22 : index
    %c0_95 = arith.constant 0 : index
    %c0_96 = arith.constant 0 : index
    %c0_97 = arith.constant 0 : index
    %139 = vector.load %arg2[%c22, %c0_95, %c0_96, %c0_97] : memref<25x4x8x64xf32, #tpu.memory_space<vmem>>, vector<1x4x8x64xf32>
    %140 = vector.shape_cast %139 : vector<1x4x8x64xf32> to vector<4x8x64xf32>
    %c22_98 = arith.constant 22 : index
    %141 = memref.load %arg3[%c22_98] : memref<26xf32, #tpu.memory_space<smem>>
    %142 = vector.broadcast %141 : f32 to vector<4x8x64xf32>
    %143 = arith.mulf %140, %142 : vector<4x8x64xf32>
    %144 = arith.addf %138, %143 : vector<4x8x64xf32>
    %c23 = arith.constant 23 : index
    %c0_99 = arith.constant 0 : index
    %c0_100 = arith.constant 0 : index
    %c0_101 = arith.constant 0 : index
    %145 = vector.load %arg2[%c23, %c0_99, %c0_100, %c0_101] : memref<25x4x8x64xf32, #tpu.memory_space<vmem>>, vector<1x4x8x64xf32>
    %146 = vector.shape_cast %145 : vector<1x4x8x64xf32> to vector<4x8x64xf32>
    %c23_102 = arith.constant 23 : index
    %147 = memref.load %arg3[%c23_102] : memref<26xf32, #tpu.memory_space<smem>>
    %148 = vector.broadcast %147 : f32 to vector<4x8x64xf32>
    %149 = arith.mulf %146, %148 : vector<4x8x64xf32>
    %150 = arith.addf %144, %149 : vector<4x8x64xf32>
    %c24 = arith.constant 24 : index
    %c0_103 = arith.constant 0 : index
    %c0_104 = arith.constant 0 : index
    %c0_105 = arith.constant 0 : index
    %151 = vector.load %arg2[%c24, %c0_103, %c0_104, %c0_105] : memref<25x4x8x64xf32, #tpu.memory_space<vmem>>, vector<1x4x8x64xf32>
    %152 = vector.shape_cast %151 : vector<1x4x8x64xf32> to vector<4x8x64xf32>
    %c24_106 = arith.constant 24 : index
    %153 = memref.load %arg3[%c24_106] : memref<26xf32, #tpu.memory_space<smem>>
    %154 = vector.broadcast %153 : f32 to vector<4x8x64xf32>
    %155 = arith.mulf %152, %154 : vector<4x8x64xf32>
    %156 = arith.addf %150, %155 : vector<4x8x64xf32>
    %157 = vector.extract_strided_slice %156 {offsets = [0, 0, 0], sizes = [1, 8, 64], strides = [1, 1, 1]} : vector<4x8x64xf32> to vector<1x8x64xf32>
    %158 = vector.shape_cast %157 : vector<1x8x64xf32> to vector<8x64xf32>
    %159 = vector.extract_strided_slice %156 {offsets = [1, 0, 0], sizes = [1, 8, 64], strides = [1, 1, 1]} : vector<4x8x64xf32> to vector<1x8x64xf32>
    %160 = vector.shape_cast %159 : vector<1x8x64xf32> to vector<8x64xf32>
    %161 = arith.maximumf %158, %160 : vector<8x64xf32>
    %162 = vector.extract_strided_slice %156 {offsets = [2, 0, 0], sizes = [1, 8, 64], strides = [1, 1, 1]} : vector<4x8x64xf32> to vector<1x8x64xf32>
    %163 = vector.shape_cast %162 : vector<1x8x64xf32> to vector<8x64xf32>
    %164 = vector.extract_strided_slice %156 {offsets = [3, 0, 0], sizes = [1, 8, 64], strides = [1, 1, 1]} : vector<4x8x64xf32> to vector<1x8x64xf32>
    %165 = vector.shape_cast %164 : vector<1x8x64xf32> to vector<8x64xf32>
    %166 = arith.maximumf %163, %165 : vector<8x64xf32>
    %167 = arith.maximumf %161, %166 : vector<8x64xf32>
    %c25 = arith.constant 25 : index
    %168 = memref.load %arg3[%c25] : memref<26xf32, #tpu.memory_space<smem>>
    %169 = vector.broadcast %168 : f32 to vector<8x64xf32>
    %170 = arith.addf %167, %169 : vector<8x64xf32>
    %cst_107 = arith.constant 0.000000e+00 : f32
    %171 = vector.broadcast %cst_107 : f32 to vector<8x64xf32>
    %172 = arith.maximumf %170, %171 : vector<8x64xf32>
    %173 = arith.truncf %172 : vector<8x64xf32> to vector<8x64xbf16>
    %c0_108 = arith.constant 0 : index
    %c0_109 = arith.constant 0 : index
    %174 = vector.load %arg6[%c0_108, %c0_109] : memref<64x256xbf16, #tpu.memory_space<vmem>>, vector<64x256xbf16>
    %cst_110 = arith.constant dense<0.000000e+00> : vector<8x256xf32>
    %175 = tpu.matmul %173, %174, %cst_110 {dimension_numbers = #tpu.dot_dimension_numbers<[1], [0], [0], [1], [0, 0, 1, 1], [], []>} : vector<8x64xbf16>, vector<64x256xbf16>, vector<8x256xf32> -> vector<8x256xf32>
    %c0_111 = arith.constant 0 : index
    %c0_112 = arith.constant 0 : index
    %176 = vector.load %arg7[%c0_111, %c0_112] : memref<1x256xf32, #tpu.memory_space<vmem>>, vector<1x256xf32>
    %177 = vector.broadcast %176 : vector<1x256xf32> to vector<8x256xf32>
    %178 = arith.addf %175, %177 : vector<8x256xf32>
    %cst_113 = arith.constant 0.000000e+00 : f32
    %179 = vector.broadcast %cst_113 : f32 to vector<8x256xf32>
    %180 = arith.maximumf %178, %179 : vector<8x256xf32>
    %181 = arith.truncf %180 : vector<8x256xf32> to vector<8x256xbf16>
    %c0_114 = arith.constant 0 : index
    %c0_115 = arith.constant 0 : index
    %182 = vector.load %arg8[%c0_114, %c0_115] : memref<256x128xbf16, #tpu.memory_space<vmem>>, vector<256x128xbf16>
    %cst_116 = arith.constant dense<0.000000e+00> : vector<8x128xf32>
    %183 = tpu.matmul %181, %182, %cst_116 {dimension_numbers = #tpu.dot_dimension_numbers<[1], [0], [0], [1], [0, 0, 1, 1], [], []>} : vector<8x256xbf16>, vector<256x128xbf16>, vector<8x128xf32> -> vector<8x128xf32>
    %c0_117 = arith.constant 0 : index
    %c0_118 = arith.constant 0 : index
    %184 = vector.load %arg9[%c0_117, %c0_118] : memref<1x128xf32, #tpu.memory_space<vmem>>, vector<1x128xf32>
    %185 = vector.broadcast %184 : vector<1x128xf32> to vector<8x128xf32>
    %186 = arith.addf %183, %185 : vector<8x128xf32>
    %cst_119 = arith.constant 0.000000e+00 : f32
    %187 = vector.broadcast %cst_119 : f32 to vector<8x128xf32>
    %188 = arith.maximumf %186, %187 : vector<8x128xf32>
    %189 = arith.truncf %7 : vector<8x384xf32> to vector<8x384xbf16>
    %c0_120 = arith.constant 0 : index
    %c0_121 = arith.constant 0 : index
    %190 = vector.load %arg10[%c0_120, %c0_121] : memref<384x256xbf16, #tpu.memory_space<vmem>>, vector<384x256xbf16>
    %cst_122 = arith.constant dense<0.000000e+00> : vector<8x256xf32>
    %191 = tpu.matmul %189, %190, %cst_122 {dimension_numbers = #tpu.dot_dimension_numbers<[1], [0], [0], [1], [0, 0, 1, 1], [], []>} : vector<8x384xbf16>, vector<384x256xbf16>, vector<8x256xf32> -> vector<8x256xf32>
    %192 = arith.truncf %188 : vector<8x128xf32> to vector<8x128xbf16>
    %c0_123 = arith.constant 0 : index
    %c0_124 = arith.constant 0 : index
    %193 = vector.load %arg11[%c0_123, %c0_124] : memref<128x256xbf16, #tpu.memory_space<vmem>>, vector<128x256xbf16>
    %cst_125 = arith.constant dense<0.000000e+00> : vector<8x256xf32>
    %194 = tpu.matmul %192, %193, %cst_125 {dimension_numbers = #tpu.dot_dimension_numbers<[1], [0], [0], [1], [0, 0, 1, 1], [], []>} : vector<8x128xbf16>, vector<128x256xbf16>, vector<8x256xf32> -> vector<8x256xf32>
    %195 = arith.addf %191, %194 : vector<8x256xf32>
    %c0_126 = arith.constant 0 : index
    %c0_127 = arith.constant 0 : index
    %196 = vector.load %arg12[%c0_126, %c0_127] : memref<1x256xf32, #tpu.memory_space<vmem>>, vector<1x256xf32>
    %197 = vector.broadcast %196 : vector<1x256xf32> to vector<8x256xf32>
    %198 = arith.addf %195, %197 : vector<8x256xf32>
    %cst_128 = arith.constant 0.000000e+00 : f32
    %199 = vector.broadcast %cst_128 : f32 to vector<8x256xf32>
    %200 = arith.maximumf %198, %199 : vector<8x256xf32>
    %201 = arith.truncf %200 : vector<8x256xf32> to vector<8x256xbf16>
    %c0_129 = arith.constant 0 : index
    %c0_130 = arith.constant 0 : index
    %202 = vector.load %arg13[%c0_129, %c0_130] : memref<256x128xbf16, #tpu.memory_space<vmem>>, vector<256x128xbf16>
    %cst_131 = arith.constant dense<0.000000e+00> : vector<8x128xf32>
    %203 = tpu.matmul %201, %202, %cst_131 {dimension_numbers = #tpu.dot_dimension_numbers<[1], [0], [0], [1], [0, 0, 1, 1], [], []>} : vector<8x256xbf16>, vector<256x128xbf16>, vector<8x128xf32> -> vector<8x128xf32>
    %c0_132 = arith.constant 0 : index
    %c0_133 = arith.constant 0 : index
    %204 = vector.load %arg14[%c0_132, %c0_133] : memref<1x128xf32, #tpu.memory_space<vmem>>, vector<1x128xf32>
    %205 = vector.broadcast %204 : vector<1x128xf32> to vector<8x128xf32>
    %206 = arith.addf %203, %205 : vector<8x128xf32>
    %cst_134 = arith.constant 0.000000e+00 : f32
    %207 = vector.broadcast %cst_134 : f32 to vector<8x128xf32>
    %208 = arith.maximumf %206, %207 : vector<8x128xf32>
    %209 = arith.truncf %208 : vector<8x128xf32> to vector<8x128xbf16>
    %c0_135 = arith.constant 0 : index
    %c0_136 = arith.constant 0 : index
    %210 = vector.load %arg15[%c0_135, %c0_136] : memref<128x64xbf16, #tpu.memory_space<vmem>>, vector<128x64xbf16>
    %cst_137 = arith.constant dense<0.000000e+00> : vector<8x64xf32>
    %211 = tpu.matmul %209, %210, %cst_137 {dimension_numbers = #tpu.dot_dimension_numbers<[1], [0], [0], [1], [0, 0, 1, 1], [], []>} : vector<8x128xbf16>, vector<128x64xbf16>, vector<8x64xf32> -> vector<8x64xf32>
    %c0_138 = arith.constant 0 : index
    %c0_139 = arith.constant 0 : index
    %212 = vector.load %arg16[%c0_138, %c0_139] : memref<1x64xf32, #tpu.memory_space<vmem>>, vector<1x64xf32>
    %213 = vector.broadcast %212 : vector<1x64xf32> to vector<8x64xf32>
    %214 = arith.addf %211, %213 : vector<8x64xf32>
    %cst_140 = arith.constant 0.000000e+00 : f32
    %215 = vector.broadcast %cst_140 : f32 to vector<8x64xf32>
    %216 = arith.maximumf %214, %215 : vector<8x64xf32>
    %217 = arith.truncf %216 : vector<8x64xf32> to vector<8x64xbf16>
    %c0_141 = arith.constant 0 : index
    %c0_142 = arith.constant 0 : index
    %218 = vector.load %arg17[%c0_141, %c0_142] : memref<64x2xbf16, #tpu.memory_space<vmem>>, vector<64x2xbf16>
    %cst_143 = arith.constant dense<0.000000e+00> : vector<8x2xf32>
    %219 = tpu.matmul %217, %218, %cst_143 {dimension_numbers = #tpu.dot_dimension_numbers<[1], [0], [0], [1], [0, 0, 1, 1], [], []>} : vector<8x64xbf16>, vector<64x2xbf16>, vector<8x2xf32> -> vector<8x2xf32>
    %c0_144 = arith.constant 0 : index
    %c0_145 = arith.constant 0 : index
    %220 = vector.load %arg18[%c0_144, %c0_145] : memref<1x2xf32, #tpu.memory_space<vmem>>, vector<1x2xf32>
    %221 = vector.broadcast %220 : vector<1x2xf32> to vector<8x2xf32>
    %222 = arith.addf %219, %221 : vector<8x2xf32>
    %c0_146 = arith.constant 0 : index
    %c0_147 = arith.constant 0 : index
    %223 = vector.load %arg19[%c0_146, %c0_147] : memref<8x2xf32, #tpu.memory_space<vmem>>, vector<8x2xf32>
    tpu.vector_store %arg19[%c0_146, %c0_147], %222 {strides = array<i32>} : memref<8x2xf32, #tpu.memory_space<vmem>>, vector<8x2xf32>,
    return
  }
  func.func @transform_0(%arg0: i32) -> (i32, i32) {
    %c0_i32 = arith.constant 0 : i32
    %c0_i32_0 = arith.constant 0 : i32
    return %arg0, %c0_i32 : i32, i32
  }
  func.func @transform_1(%arg0: i32) -> (i32, i32, i32, i32) {
    %c0_i32 = arith.constant 0 : i32
    %c0_i32_0 = arith.constant 0 : i32
    %c0_i32_1 = arith.constant 0 : i32
    %c0_i32_2 = arith.constant 0 : i32
    return %c0_i32, %c0_i32_0, %arg0, %c0_i32_1 : i32, i32, i32, i32
  }
  func.func @transform_2(%arg0: i32) -> i32 {
    %c0_i32 = arith.constant 0 : i32
    %c0_i32_0 = arith.constant 0 : i32
    return %c0_i32 : i32
  }
  func.func @transform_3(%arg0: i32) -> (i32, i32) {
    %c0_i32 = arith.constant 0 : i32
    %c0_i32_0 = arith.constant 0 : i32
    %c0_i32_1 = arith.constant 0 : i32
    return %c0_i32, %c0_i32_0 : i32, i32
  }
  func.func @transform_4(%arg0: i32) -> (i32, i32) {
    %c0_i32 = arith.constant 0 : i32
    %c0_i32_0 = arith.constant 0 : i32
    %c0_i32_1 = arith.constant 0 : i32
    return %c0_i32, %c0_i32_0 : i32, i32
  }
  func.func @transform_5(%arg0: i32) -> (i32, i32) {
    %c0_i32 = arith.constant 0 : i32
    %c0_i32_0 = arith.constant 0 : i32
    %c0_i32_1 = arith.constant 0 : i32
    return %c0_i32, %c0_i32_0 : i32, i32
  }
  func.func @transform_6(%arg0: i32) -> (i32, i32) {
    %c0_i32 = arith.constant 0 : i32
    %c0_i32_0 = arith.constant 0 : i32
    %c0_i32_1 = arith.constant 0 : i32
    return %c0_i32, %c0_i32_0 : i32, i32
  }
  func.func @transform_7(%arg0: i32) -> (i32, i32) {
    %c0_i32 = arith.constant 0 : i32
    %c0_i32_0 = arith.constant 0 : i32
    %c0_i32_1 = arith.constant 0 : i32
    return %c0_i32, %c0_i32_0 : i32, i32
  }
  func.func @transform_8(%arg0: i32) -> (i32, i32) {
    %c0_i32 = arith.constant 0 : i32
    %c0_i32_0 = arith.constant 0 : i32
    %c0_i32_1 = arith.constant 0 : i32
    return %c0_i32, %c0_i32_0 : i32, i32
  }
  func.func @transform_9(%arg0: i32) -> (i32, i32) {
    %c0_i32 = arith.constant 0 : i32
    %c0_i32_0 = arith.constant 0 : i32
    %c0_i32_1 = arith.constant 0 : i32
    return %c0_i32, %c0_i32_0 : i32, i32
  }
  func.func @transform_10(%arg0: i32) -> (i32, i32) {
    %c0_i32 = arith.constant 0 : i32
    %c0_i32_0 = arith.constant 0 : i32
    %c0_i32_1 = arith.constant 0 : i32
    return %c0_i32, %c0_i32_0 : i32, i32
  }
  func.func @transform_11(%arg0: i32) -> (i32, i32) {
    %c0_i32 = arith.constant 0 : i32
    %c0_i32_0 = arith.constant 0 : i32
    %c0_i32_1 = arith.constant 0 : i32
    return %c0_i32, %c0_i32_0 : i32, i32
  }
  func.func @transform_12(%arg0: i32) -> (i32, i32) {
    %c0_i32 = arith.constant 0 : i32
    %c0_i32_0 = arith.constant 0 : i32
    %c0_i32_1 = arith.constant 0 : i32
    return %c0_i32, %c0_i32_0 : i32, i32
  }
  func.func @transform_13(%arg0: i32) -> (i32, i32) {
    %c0_i32 = arith.constant 0 : i32
    %c0_i32_0 = arith.constant 0 : i32
    %c0_i32_1 = arith.constant 0 : i32
    return %c0_i32, %c0_i32_0 : i32, i32
  }
  func.func @transform_14(%arg0: i32) -> (i32, i32) {
    %c0_i32 = arith.constant 0 : i32
    %c0_i32_0 = arith.constant 0 : i32
    %c0_i32_1 = arith.constant 0 : i32
    return %c0_i32, %c0_i32_0 : i32, i32
  }
  func.func @transform_15(%arg0: i32) -> (i32, i32) {
    %c0_i32 = arith.constant 0 : i32
    %c0_i32_0 = arith.constant 0 : i32
    %c0_i32_1 = arith.constant 0 : i32
    return %c0_i32, %c0_i32_0 : i32, i32
  }
  func.func @transform_16(%arg0: i32) -> (i32, i32) {
    %c0_i32 = arith.constant 0 : i32
    %c0_i32_0 = arith.constant 0 : i32
    %c0_i32_1 = arith.constant 0 : i32
    return %c0_i32, %c0_i32_0 : i32, i32
  }
  func.func @transform_17(%arg0: i32) -> (i32, i32) {
    %c0_i32 = arith.constant 0 : i32
    %c0_i32_0 = arith.constant 0 : i32
    %c0_i32_1 = arith.constant 0 : i32
    return %c0_i32, %c0_i32_0 : i32, i32
  }
  func.func @transform_18(%arg0: i32) -> (i32, i32) {
    %c0_i32 = arith.constant 0 : i32
    %c0_i32_0 = arith.constant 0 : i32
    return %arg0, %c0_i32 : i32, i32
  }
}

</mosaic_0001>

<bundles_post_ra>
// kernel: whitebox_attack_forward.1
= control target key start
LH: loop header
LB: loop body
LE: loop exit
PB: predicated region body
PF: predicated region fallthrough
CT: control target
= control target key end

     0   :  { %s3499_s0 = inlined_call_operand.vmem [shape: bf16[8,17], index: 0, kind: input, shape index: {}]   ;;  %s3500_s1 = inlined_call_operand.vmem [shape: f32[25,4,8,64], index: 1, kind: input, shape index: {}]   ;;  %s3501_s2 = inlined_call_operand.vmem [shape: f32[26], index: 2, kind: input, shape index: {}]   ;;  %s3502_s3 = inlined_call_operand.vmem [shape: bf16[17,384], index: 3, kind: input, shape index: {}]   ;;  %s3503_s4 = inlined_call_operand.vmem [shape: f32[1,384], index: 4, kind: input, shape index: {}]   ;;  %s3504_s5 = inlined_call_operand.vmem [shape: bf16[64,256], index: 5, kind: input, shape index: {}]   ;;  %s3505_s6 = inlined_call_operand.vmem [shape: f32[1,256], index: 6, kind: input, shape index: {}]   ;;  %s3506_s7 = inlined_call_operand.vmem [shape: bf16[256,128], index: 7, kind: input, shape index: {}]   ;;  %s3507_s8 = inlined_call_operand.vmem [shape: f32[1,128], index: 8, kind: input, shape index: {}]   ;;  %s3508_s9 = inlined_call_operand.vmem [shape: bf16[384,256], index: 9, kind: input, shape index: {}]   ;;  %s3509_s10 = inlined_call_operand.vmem [shape: bf16[128,256], index: 10, kind: input, shape index: {}]   ;;  %s3510_s11 = inlined_call_operand.vmem [shape: f32[1,256], index: 11, kind: input, shape index: {}]   ;;  %s3511_s12 = inlined_call_operand.vmem [shape: bf16[256,128], index: 12, kind: input, shape index: {}]   ;;  %s3512_s13 = inlined_call_operand.vmem [shape: f32[1,128], index: 13, kind: input, shape index: {}]   ;;  %s3513_s14 = inlined_call_operand.vmem [shape: bf16[128,64], index: 14, kind: input, shape index: {}]   ;;  %s3514_s15 = inlined_call_operand.vmem [shape: f32[1,64], index: 15, kind: input, shape index: {}]   ;;  %s3515_s16 = inlined_call_operand.vmem [shape: bf16[64,2], index: 16, kind: input, shape index: {}]   ;;  %s3516_s17 = inlined_call_operand.vmem [shape: f32[1,2], index: 17, kind: input, shape index: {}]   ;;  %s3517_s18 = inlined_call_operand.vmem [shape: f32[8,2], index: 18, kind: output, shape index: {}]  }
   0x1   :  { %3519 = sst [smem:[#allocation5_spill]] %s3499_s0 }
   0x2   :  { %3520 = sst [smem:[#allocation6_spill]] %s3500_s1 }
   0x3   :  { %3521 = sst [smem:[#allocation7_spill]] %s3501_s2 }
   0x4   :  { %3522 = sst [smem:[#allocation8_spill]] %s3517_s18 }
   0x5   :  { %23 = vsyncpa [#allocation3], 0  ;;  %s3523_s29 = sld [smem:[#allocation7_spill]]  ;;  %s2343_s0 = smov [#allocation2]  }
   0xb   :  { %s33_s30 = sshll.u32 %s3523_s29, 4  ;;  %s34_s30 = int_to_ptr.vmem [resolvable:$true] %s33_s30 }
   0xc   :  { %36 = dma.vmem_to_smem %s34_s30, 16, %s2343_s0, [#allocation3]  }
   0xd   :  { %2341 = dma.done.wait [#allocation3], 16  }
   0xe   :  { %2342 = vsyncadd [#allocation3], 4294967280 }
   0xf   :  { %71 = sfence }
  0x10   :  { %v78_v0 = vld [vmem:[%s3502_s3 + $0x18] sm:$0x11]  ;;  %vm116_vm0 = vcmask 1040384   ;;  %v2344_v3 = vmov 0   ;;  %v2204_v7 = vld [vmem:[%s3502_s3 + $0x4] sm:$0xf] }
  0x11   :  { %v101_v1 = vunpack.c.h.b16 %v78_v0  ;;  %v100_v2 = vunpack.c.l.b16 %v78_v0  ;;  %v2446_v4 = vsel %vm116_vm0, 65535, %v2344_v3  ;;  %v1605_v8 = vld [vmem:[%s3502_s3 + $0xc] sm:$0xf0]  ;;  %v1603_v9 = vld [vmem:[%s3502_s3] sm:$0xf]  ;;  %s2486_s28 = sld [smem:[#allocation2]] }
  0x12   :  { %v2205_v10 = vld [vmem:[%s3502_s3 + $0x8] sm:$0xf0]  ;;  %v1763_v11 = vld [vmem:[%s3504_s5 + $0x30] sm:$0xf]  ;;  %v2214_v14 = vld [vmem:[%s3504_s5 + $0x34] sm:$0xf0]  ;;  %v1608_v17 = vor.u32 %v2204_v7, %v1605_v8 }
  0x13   :  { %v107_v5 = vpack.c.b16 %v101_v1, %v101_v1  ;;  %v106_v6 = vpack.c.b16 %v100_v2, %v100_v2  ;;  %v2213_v15 = vld [vmem:[%s3504_s5 + $0x34] sm:$0xf]  ;;  %v1765_v16 = vld [vmem:[%s3504_s5 + $0x38] sm:$0xf0]  ;;  %v1604_v18 = vor.u32 %v2205_v10, %v1603_v9  ;;  %v1755_v19 = vld [vmem:[%s3504_s5 + $0x20] sm:$0xf]  ;;  %v1764_v21 = vor.u32 %v2214_v14, %v1763_v11 }
  0x14   :  { %v2212_v20 = vld [vmem:[%s3504_s5 + $0x24] sm:$0xf0]  ;;  %v1768_v22 = vor.u32 %v2213_v15, %v1765_v16  ;;  %v2211_v23 = vld [vmem:[%s3504_s5 + $0x24] sm:$0xf]  ;;  %v1757_v24 = vld [vmem:[%s3504_s5 + $0x28] sm:$0xf0] }
  0x15   :  { %v123_v12 = vand.u32 %v2446_v4, %v107_v5  ;;  %v120_v13 = vand.u32 %v2446_v4, %v106_v6  ;;  %s3524_s0 = sld [smem:[#allocation5_spill]]  ;;  %v2496_v26 = vld [vmem:[%s3504_s5 + $0x10] sm:$0xf]  ;;  %v2501_v27 = vld [vmem:[%s3504_s5 + $0x14] sm:$0xf0]  ;;  %vm112_vm1 = vcmask 138240   ;;  %v1756_v34 = vor.u32 %v2212_v20, %v1755_v19 }
  0x16   :  { %s2503_s22 = sld [smem:[#allocation2 + $0x1]]  ;;  %v2508_v28 = vld [vmem:[%s3504_s5 + $0x14] sm:$0xf]  ;;  %v2513_v29 = vld [vmem:[%s3504_s5 + $0x18] sm:$0xf0]  ;;  %v1760_v35 = vor.u32 %v2211_v23, %v1757_v24  ;;  %v1748_v42 = vor.u32 %v2501_v27, %v2496_v26  ;;  %vm602_vm2 = vcmask 523264  }
  0x17   :  { %147 = vmatpush.bf16.msra.mxu3 %v123_v12  ;;  %134 = vmatpush.bf16.msra.mxu0 %v120_v13  ;;  %s2515_s26 = sld [smem:[#allocation2 + $0x2]]  ;;  %v2520_v30 = vld [vmem:[%s3504_s5] sm:$0xf]  ;;  %v2525_v31 = vld [vmem:[%s3504_s5 + $0x4] sm:$0xf0]  ;;  %v1752_v43 = vor.u32 %v2508_v28, %v2513_v29  ;;  %v175_v44 = vstv %s2486_s28  ;;  %vm1594_vm3 = vcmask 15360  }
  0x18   :  { %v2530_v32 = vld [vmem:[%s3504_s5 + $0x4] sm:$0xf]  ;;  %s3525_s2 = sld [smem:[#allocation6_spill]]  ;;  %v2551_v39 = vld [vmem:[%s3504_s5 + $0x8] sm:$0xf0]  ;;  %v1740_v55 = vor.u32 %v2525_v31, %v2520_v30 }
  0x19   :  { %s2535_s23 = sld [smem:[#allocation2 + $0x3]]  ;;  %v1744_v56 = vor.u32 %v2530_v32, %v2551_v39 }
  0x1a   :  { %s2546_s19 = sld [smem:[#allocation2 + $0x4]] }
  0x1b   :  { %v2491_v25 = vld [vmem:[%s3524_s0] sm:$0xf]  ;;  %148 = vmatpush.bf16.msra.mxu3 %v1608_v17  ;;  %135 = vmatpush.bf16.msra.mxu0 %v1604_v18  ;;  %s2559_s27 = sld [smem:[#allocation2 + $0x5]] }
  0x1c   :  { %s2579_s20 = sld [smem:[#allocation2 + $0x6]]  ;;  %v186_v57 = vstv %s2503_s22 }
  0x1d   :  { %v201_v58 = vstv %s2515_s26  ;;  %s2596_s29 = sld [smem:[#allocation2 + $0x7]] }
  0x1e   :  { %v170_v33 = vld [vmem:[%s3525_s2] sm:$0xff]  ;;  %v171_v36 = vld [vmem:[%s3525_s2 + $0x8] sm:$0xff]  ;;  %v172_v37 = vld [vmem:[%s3525_s2 + $0x10] sm:$0xff]  ;;  %1614 = vmatmul.msk.bf16.vlgmr.msra.gmra.mxu3 %vm112_vm1, %v2491_v25  ;;  %1613 = vmatmul.msk.bf16.vlgmr.msra.gmra.mxu0 %vm112_vm1, %v2491_v25  ;;  %s2626_s26 = sld [smem:[#allocation2 + $0x8]] }
  0x1f   :  { %610 = vmatpush.bf16.msrb.mxu3 %v1764_v21  ;;  %623 = vmatpush.bf16.msrb.mxu0 %v1768_v22  ;;  %v173_v38 = vld [vmem:[%s3525_s2 + $0x18] sm:$0xff]  ;;  %v1616_v40 = vld [vmem:[%s3525_s2 + $0x20] sm:$0xff]  ;;  %v1617_v41 = vld [vmem:[%s3525_s2 + $0x28] sm:$0xff]  ;;  %v176_v48 = vmul.f32 %v175_v44, %v170_v33  ;;  %v177_v49 = vmul.f32 %v175_v44, %v171_v36  ;;  %v178_v50 = vmul.f32 %v175_v44, %v172_v37  ;;  %v216_v16 = vstv %s2535_s23  ;;  %s2642_s30 = sld [smem:[#allocation2 + $0xa]] }
  0x20   :  { %v1618_v45 = vld [vmem:[%s3525_s2 + $0x30] sm:$0xff]  ;;  %v1619_v46 = vld [vmem:[%s3525_s2 + $0x38] sm:$0xff]  ;;  %v1621_v47 = vld [vmem:[%s3525_s2 + $0x40] sm:$0xff]  ;;  %v179_v51 = vmul.f32 %v175_v44, %v173_v38  ;;  %v187_v59 = vmul.f32 %v1616_v40, %v186_v57  ;;  %v188_v60 = vmul.f32 %v1617_v41, %v186_v57  ;;  %v231_v17 = vstv %s2546_s19  ;;  %s2669_s22 = sld [smem:[#allocation2 + $0xb]] }
  0x21   :  { %v1622_v52 = vld [vmem:[%s3525_s2 + $0x48] sm:$0xff]  ;;  %v1623_v53 = vld [vmem:[%s3525_s2 + $0x50] sm:$0xff]  ;;  %v1624_v54 = vld [vmem:[%s3525_s2 + $0x58] sm:$0xff]  ;;  %v189_v61 = vmul.f32 %v1618_v45, %v186_v57  ;;  %v190_v62 = vmul.f32 %v1619_v46, %v186_v57  ;;  %v202_v1 = vmul.f32 %v1621_v47, %v201_v58  ;;  %v246_v18 = vstv %s2559_s27  ;;  %s2637_s27 = sld [smem:[#allocation2 + $0x9]] }
  0x22   :  { %v1626_v63 = vld [vmem:[%s3525_s2 + $0x60] sm:$0xff]  ;;  %v1627_v0 = vld [vmem:[%s3525_s2 + $0x68] sm:$0xff]  ;;  %v203_v2 = vmul.f32 %v1622_v52, %v201_v58  ;;  %v204_v3 = vmul.f32 %v1623_v53, %v201_v58  ;;  %v205_v5 = vmul.f32 %v1624_v54, %v201_v58  ;;  %v1628_v6 = vld [vmem:[%s3525_s2 + $0x70] sm:$0xff]  ;;  %v191_v9 = vadd.f32 %v187_v59, %v176_v48  ;;  %s2691_s24 = sld [smem:[#allocation2 + $0xd]] }
  0x23   :  { %611 = vmatpush.bf16.msrb.mxu3 %v1756_v34  ;;  %624 = vmatpush.bf16.msrb.mxu0 %v1760_v35  ;;  %v1629_v7 = vld [vmem:[%s3525_s2 + $0x78] sm:$0xff]  ;;  %v1631_v8 = vld [vmem:[%s3525_s2 + $0x80] sm:$0xff]  ;;  %v192_v10 = vadd.f32 %v188_v60, %v177_v49  ;;  %v193_v11 = vadd.f32 %v189_v61, %v178_v50  ;;  %v194_v12 = vadd.f32 %v190_v62, %v179_v51  ;;  %v1632_v13 = vld [vmem:[%s3525_s2 + $0x88] sm:$0xff]  ;;  %v261_v19 = vstv %s2579_s20  ;;  %s2680_s20 = sld [smem:[#allocation2 + $0xc]] }
  0x24   :  { %v1633_v14 = vld [vmem:[%s3525_s2 + $0x90] sm:$0xff]  ;;  %v1634_v15 = vld [vmem:[%s3525_s2 + $0x98] sm:$0xff]  ;;  %v206_v20 = vadd.f32 %v202_v1, %v191_v9  ;;  %v217_v24 = vmul.f32 %v1626_v63, %v216_v16  ;;  %v218_v26 = vmul.f32 %v1627_v0, %v216_v16  ;;  %v219_v27 = vmul.f32 %v1628_v6, %v216_v16  ;;  %v1636_v29 = vld [vmem:[%s3525_s2 + $0xa0] sm:$0xff]  ;;  %s2726_s0 = sld [smem:[#allocation2 + $0xe]] }
  0x25   :  { %v207_v21 = vadd.f32 %v203_v2, %v192_v10  ;;  %v208_v22 = vadd.f32 %v204_v3, %v193_v11  ;;  %v209_v23 = vadd.f32 %v205_v5, %v194_v12  ;;  %v220_v28 = vmul.f32 %v1629_v7, %v216_v16  ;;  %v1637_v30 = vld [vmem:[%s3525_s2 + $0xa8] sm:$0xff]  ;;  %v1638_v31 = vld [vmem:[%s3525_s2 + $0xb0] sm:$0xff]  ;;  %v1639_v36 = vld [vmem:[%s3525_s2 + $0xb8] sm:$0xff]  ;;  %s2737_s5 = sld [smem:[#allocation2 + $0xf]] }
  0x26   :  { %v232_v32 = vmul.f32 %v1631_v8, %v231_v17  ;;  %v233_v33 = vmul.f32 %v1632_v13, %v231_v17  ;;  %v234_v34 = vmul.f32 %v1633_v14, %v231_v17  ;;  %v235_v35 = vmul.f32 %v1634_v15, %v231_v17  ;;  %v1641_v40 = vld [vmem:[%s3525_s2 + $0xc0] sm:$0xff]  ;;  %v1642_v41 = vld [vmem:[%s3525_s2 + $0xc8] sm:$0xff]  ;;  %v1644_v48 = vld [vmem:[%s3525_s2 + $0xd8] sm:$0xff]  ;;  %s2745_s18 = sld [smem:[#allocation2 + $0x10]] }
  0x27   :  { %612 = vmatpush.bf16.msrb.mxu3 %v1748_v42  ;;  %625 = vmatpush.bf16.msrb.mxu0 %v1752_v43  ;;  %v221_v37 = vadd.f32 %v217_v24, %v206_v20  ;;  %v222_v38 = vadd.f32 %v218_v26, %v207_v21  ;;  %v223_v39 = vadd.f32 %v219_v27, %v208_v22  ;;  %v1643_v42 = vld [vmem:[%s3525_s2 + $0xd0] sm:$0xff]  ;;  %v276_v43 = vstv %s2596_s29  ;;  %v1646_v53 = vld [vmem:[%s3525_s2 + $0xe0] sm:$0xff]  ;;  %v1647_v54 = vld [vmem:[%s3525_s2 + $0xe8] sm:$0xff]  ;;  %s2797_s1 = sld [smem:[#allocation2 + $0x13]] }
  0x28   :  { %v224_v44 = vadd.f32 %v220_v28, %v209_v23  ;;  %v247_v45 = vmul.f32 %v1636_v29, %v246_v18  ;;  %v248_v46 = vmul.f32 %v1637_v30, %v246_v18  ;;  %v249_v47 = vmul.f32 %v1638_v31, %v246_v18  ;;  %v1649_v60 = vld [vmem:[%s3525_s2 + $0xf8] sm:$0xff]  ;;  %v1651_v6 = vld [vmem:[%s3525_s2 + $0x100] sm:$0xff]  ;;  %v1652_v7 = vld [vmem:[%s3525_s2 + $0x108] sm:$0xff]  ;;  %s2805_s25 = sld [smem:[#allocation2 + $0x14]] }
  0x29   :  { %v236_v49 = vadd.f32 %v232_v32, %v221_v37  ;;  %v237_v50 = vadd.f32 %v233_v33, %v222_v38  ;;  %v238_v51 = vadd.f32 %v234_v34, %v223_v39  ;;  %v250_v52 = vmul.f32 %v1639_v36, %v246_v18  ;;  %v1653_v8 = vld [vmem:[%s3525_s2 + $0x110] sm:$0xff]  ;;  %v1654_v13 = vld [vmem:[%s3525_s2 + $0x118] sm:$0xff]  ;;  %v1656_v14 = vld [vmem:[%s3525_s2 + $0x120] sm:$0xff]  ;;  %s2852_s29 = sld [smem:[#allocation2 + $0x16]] }
  0x2a   :  { %v262_v57 = vmul.f32 %v1641_v40, %v261_v19  ;;  %v263_v58 = vmul.f32 %v1642_v41, %v261_v19  ;;  %v264_v59 = vmul.f32 %v1643_v42, %v261_v19  ;;  %v265_v0 = vmul.f32 %v1644_v48, %v261_v19  ;;  %v1657_v15 = vld [vmem:[%s3525_s2 + $0x128] sm:$0xff]  ;;  %v1658_v18 = vld [vmem:[%s3525_s2 + $0x130] sm:$0xff]  ;;  %v1659_v26 = vld [vmem:[%s3525_s2 + $0x138] sm:$0xff]  ;;  %s2933_s28 = sld [smem:[#allocation2 + $0x19]] }
  0x2b   :  { %613 = vmatpush.bf16.msrb.mxu3 %v1740_v55  ;;  %626 = vmatpush.bf16.msrb.mxu0 %v1744_v56  ;;  %v1648_v55 = vld [vmem:[%s3525_s2 + $0xf0] sm:$0xff]  ;;  %v239_v56 = vadd.f32 %v235_v35, %v224_v44  ;;  %v251_v61 = vadd.f32 %v247_v45, %v236_v49  ;;  %v252_v62 = vadd.f32 %v248_v46, %v237_v50  ;;  %v291_v17 = vstv %s2626_s26  ;;  %v1661_v31 = vld [vmem:[%s3525_s2 + $0x140] sm:$0xff]  ;;  %v1662_v32 = vld [vmem:[%s3525_s2 + $0x148] sm:$0xff]  ;;  %s2810_s26 = sld [smem:[#allocation2 + $0x15]] }
  0x2c   :  { %v253_v63 = vadd.f32 %v249_v47, %v238_v51  ;;  %v277_v2 = vmul.f32 %v1646_v53, %v276_v43  ;;  %v278_v3 = vmul.f32 %v1647_v54, %v276_v43  ;;  %v279_v5 = vmul.f32 %v1648_v55, %v276_v43  ;;  %v1663_v33 = vld [vmem:[%s3525_s2 + $0x150] sm:$0xff]  ;;  %v1664_v38 = vld [vmem:[%s3525_s2 + $0x158] sm:$0xff]  ;;  %v1667_v48 = vld [vmem:[%s3525_s2 + $0x168] sm:$0xff] }
  0x2d   :  { %v254_v1 = vadd.f32 %v250_v52, %v239_v56  ;;  %v266_v9 = vadd.f32 %v262_v57, %v251_v61  ;;  %v267_v10 = vadd.f32 %v263_v58, %v252_v62  ;;  %v280_v12 = vmul.f32 %v1649_v60, %v276_v43  ;;  %v1666_v43 = vld [vmem:[%s3525_s2 + $0x160] sm:$0xff]  ;;  %v1668_v49 = vld [vmem:[%s3525_s2 + $0x170] sm:$0xff]  ;;  %v1669_v50 = vld [vmem:[%s3525_s2 + $0x178] sm:$0xff] }
  0x2e   :  { %v268_v11 = vadd.f32 %v264_v59, %v253_v63  ;;  %v306_v19 = vstv %s2637_s27  ;;  %v321_v20 = vstv %s2642_s30  ;;  %v292_v24 = vmul.f32 %v1651_v6, %v291_v17  ;;  %v1671_v55 = vld [vmem:[%s3525_s2 + $0x180] sm:$0xff]  ;;  %v1672_v56 = vld [vmem:[%s3525_s2 + $0x188] sm:$0xff]  ;;  %s2750_s27 = sld [smem:[#allocation2 + $0x11]] }
  0x2f   :  { %v269_v16 = vadd.f32 %v265_v0, %v254_v1  ;;  %v281_v21 = vadd.f32 %v277_v2, %v266_v9  ;;  %v282_v22 = vadd.f32 %v278_v3, %v267_v10  ;;  %v293_v28 = vmul.f32 %v1652_v7, %v291_v17  ;;  %v1673_v57 = vld [vmem:[%s3525_s2 + $0x190] sm:$0xff]  ;;  %v1674_v60 = vld [vmem:[%s3525_s2 + $0x198] sm:$0xff]  ;;  %v1676_v3 = vld [vmem:[%s3525_s2 + $0x1a0] sm:$0xff] }
  0x30   :  { %v283_v23 = vadd.f32 %v279_v5, %v268_v11  ;;  %v294_v29 = vmul.f32 %v1653_v8, %v291_v17  ;;  %v295_v30 = vmul.f32 %v1654_v13, %v291_v17  ;;  %v307_v35 = vmul.f32 %v1656_v14, %v306_v19  ;;  %v1677_v9 = vld [vmem:[%s3525_s2 + $0x1a8] sm:$0xff]  ;;  %v1678_v10 = vld [vmem:[%s3525_s2 + $0x1b0] sm:$0xff]  ;;  %v1679_v11 = vld [vmem:[%s3525_s2 + $0x1b8] sm:$0xff] }
  0x31   :  { %v284_v27 = vadd.f32 %v280_v12, %v269_v16  ;;  %v296_v34 = vadd.f32 %v292_v24, %v281_v21  ;;  %v308_v36 = vmul.f32 %v1657_v15, %v306_v19  ;;  %v309_v37 = vmul.f32 %v1658_v18, %v306_v19  ;;  %v1682_v21 = vld [vmem:[%s3525_s2 + $0x1c8] sm:$0xff] }
  0x32   :  { %v297_v39 = vadd.f32 %v293_v28, %v282_v22  ;;  %v298_v40 = vadd.f32 %v294_v29, %v283_v23  ;;  %v310_v42 = vmul.f32 %v1659_v26, %v306_v19  ;;  %v322_v45 = vmul.f32 %v1661_v31, %v321_v20  ;;  %v1683_v22 = vld [vmem:[%s3525_s2 + $0x1d0] sm:$0xff]  ;;  %v1684_v28 = vld [vmem:[%s3525_s2 + $0x1d8] sm:$0xff]  ;;  %v1686_v29 = vld [vmem:[%s3525_s2 + $0x1e0] sm:$0xff] }
  0x33   :  { %v299_v41 = vadd.f32 %v295_v30, %v284_v27  ;;  %v311_v44 = vadd.f32 %v307_v35, %v296_v34  ;;  %v323_v46 = vmul.f32 %v1662_v32, %v321_v20  ;;  %v324_v47 = vmul.f32 %v1663_v33, %v321_v20  ;;  %v1687_v34 = vld [vmem:[%s3525_s2 + $0x1e8] sm:$0xff] }
  0x34   :  { %v312_v51 = vadd.f32 %v308_v36, %v297_v39  ;;  %v313_v52 = vadd.f32 %v309_v37, %v298_v40  ;;  %v325_v54 = vmul.f32 %v1664_v38, %v321_v20  ;;  %v336_v59 = vstv %s2669_s22  ;;  %v1681_v20 = vld [vmem:[%s3525_s2 + $0x1c0] sm:$0xff]  ;;  %v1688_v39 = vld [vmem:[%s3525_s2 + $0x1f0] sm:$0xff]  ;;  %v1689_v40 = vld [vmem:[%s3525_s2 + $0x1f8] sm:$0xff]  ;;  %s3526_s22 = sld [smem:[#allocation8_spill]] }
  0x35   :  { %v314_v53 = vadd.f32 %v310_v42, %v299_v41  ;;  %v326_v58 = vadd.f32 %v322_v45, %v311_v44  ;;  %v351_v61 = vstv %s2680_s20  ;;  %v366_v62 = vstv %s2691_s24  ;;  %v1691_v45 = vld [vmem:[%s3525_s2 + $0x200] sm:$0xff] }
  0x36   :  { %v327_v63 = vadd.f32 %v323_v46, %v312_v51  ;;  %v328_v0 = vadd.f32 %v324_v47, %v313_v52  ;;  %v337_v2 = vmul.f32 %v1666_v43, %v336_v59  ;;  %v338_v5 = vmul.f32 %v1667_v48, %v336_v59  ;;  %v1692_v46 = vld [vmem:[%s3525_s2 + $0x208] sm:$0xff]  ;;  %v1693_v47 = vld [vmem:[%s3525_s2 + $0x210] sm:$0xff] }
  0x37   :  { %v329_v1 = vadd.f32 %v325_v54, %v314_v53  ;;  %v339_v6 = vmul.f32 %v1668_v49, %v336_v59  ;;  %v340_v7 = vmul.f32 %v1669_v50, %v336_v59  ;;  %v352_v8 = vmul.f32 %v1671_v55, %v351_v61  ;;  %v1694_v50 = vld [vmem:[%s3525_s2 + $0x218] sm:$0xff] }
  0x38   :  { %v341_v12 = vadd.f32 %v337_v2, %v326_v58  ;;  %v353_v13 = vmul.f32 %v1672_v56, %v351_v61  ;;  %v354_v14 = vmul.f32 %v1673_v57, %v351_v61  ;;  %v355_v15 = vmul.f32 %v1674_v60, %v351_v61  ;;  %v1696_v57 = vld [vmem:[%s3525_s2 + $0x220] sm:$0xff] }
  0x39   :  { %v342_v16 = vadd.f32 %v338_v5, %v327_v63  ;;  %v343_v17 = vadd.f32 %v339_v6, %v328_v0  ;;  %v344_v18 = vadd.f32 %v340_v7, %v329_v1  ;;  %v367_v19 = vmul.f32 %v1676_v3, %v366_v62  ;;  %v1698_v63 = vld [vmem:[%s3525_s2 + $0x230] sm:$0xff]  ;;  %v1699_v0 = vld [vmem:[%s3525_s2 + $0x238] sm:$0xff]  ;;  %v1701_v6 = vld [vmem:[%s3525_s2 + $0x240] sm:$0xff] }
  0x3a   :  { %v356_v23 = vadd.f32 %v352_v8, %v341_v12  ;;  %v368_v24 = vmul.f32 %v1677_v9, %v366_v62  ;;  %v369_v26 = vmul.f32 %v1678_v10, %v366_v62  ;;  %v370_v27 = vmul.f32 %v1679_v11, %v366_v62  ;;  %v1697_v62 = vld [vmem:[%s3525_s2 + $0x228] sm:$0xff]  ;;  %v1703_v12 = vld [vmem:[%s3525_s2 + $0x250] sm:$0xff] }
  0x3b   :  { %v357_v30 = vadd.f32 %v353_v13, %v342_v16  ;;  %v358_v31 = vadd.f32 %v354_v14, %v343_v17  ;;  %v359_v32 = vadd.f32 %v355_v15, %v344_v18  ;;  %v381_v33 = vstv %s2726_s0  ;;  %s2786_s0 = sld [smem:[#allocation2 + $0x12]]  ;;  %v1702_v11 = vld [vmem:[%s3525_s2 + $0x248] sm:$0xff]  ;;  %v2222_v13 = vld [vmem:[%s3506_s7 + $0x38] sm:$0xff] }
  0x3c   :  { %v371_v35 = vadd.f32 %v367_v19, %v356_v23  ;;  %v382_v36 = vmul.f32 %v1681_v20, %v381_v33  ;;  %v383_v37 = vmul.f32 %v1682_v21, %v381_v33  ;;  %v384_v38 = vmul.f32 %v1683_v22, %v381_v33  ;;  %v1704_v18 = vld [vmem:[%s3525_s2 + $0x258] sm:$0xff]  ;;  %v1706_v23 = vld [vmem:[%s3525_s2 + $0x260] sm:$0xff]  ;;  %768 = vmatpush.bf16.msra.mxu1 %v2222_v13 }
  0x3d   :  { %v372_v41 = vadd.f32 %v368_v24, %v357_v30  ;;  %v373_v42 = vadd.f32 %v369_v26, %v358_v31  ;;  %v374_v43 = vadd.f32 %v370_v27, %v359_v32  ;;  %v385_v44 = vmul.f32 %v1684_v28, %v381_v33  ;;  %v2221_v24 = vld [vmem:[%s3506_s7 + $0x30] sm:$0xff]  ;;  %v1707_v30 = vld [vmem:[%s3525_s2 + $0x268] sm:$0xff]  ;;  %v1709_v32 = vld [vmem:[%s3525_s2 + $0x278] sm:$0xff] }
  0x3e   :  { %v386_v48 = vadd.f32 %v382_v36, %v371_v35  ;;  %v396_v49 = vstv %s2737_s5  ;;  %v411_v51 = vstv %s2745_s18  ;;  %v426_v52 = vstv %s2750_s27  ;;  %v1708_v31 = vld [vmem:[%s3525_s2 + $0x270] sm:$0xff]  ;;  %s2874_s5 = sld [smem:[#allocation2 + $0x18]] }
  0x3f   :  { %v387_v53 = vadd.f32 %v383_v37, %v372_v41  ;;  %v388_v54 = vadd.f32 %v384_v38, %v373_v42  ;;  %v389_v55 = vadd.f32 %v385_v44, %v374_v43  ;;  %v397_v56 = vmul.f32 %v1686_v29, %v396_v49  ;;  %v1711_v37 = vld [vmem:[%s3525_s2 + $0x280] sm:$0xff]  ;;  %v1712_v38 = vld [vmem:[%s3525_s2 + $0x288] sm:$0xff]  ;;  %v1714_v42 = vld [vmem:[%s3525_s2 + $0x298] sm:$0xff] }
  0x40   :  { %v398_v58 = vmul.f32 %v1687_v34, %v396_v49  ;;  %v399_v59 = vmul.f32 %v1688_v39, %v396_v49  ;;  %v400_v60 = vmul.f32 %v1689_v40, %v396_v49  ;;  %v412_v61 = vmul.f32 %v1691_v45, %v411_v51  ;;  %v1713_v39 = vld [vmem:[%s3525_s2 + $0x290] sm:$0xff]  ;;  %v1716_v49 = vld [vmem:[%s3525_s2 + $0x2a0] sm:$0xff]  ;;  %769 = vmatpush.bf16.msra.mxu1 %v2221_v24 }
  0x41   :  { %v401_v1 = vadd.f32 %v397_v56, %v386_v48  ;;  %v413_v2 = vmul.f32 %v1692_v46, %v411_v51  ;;  %v414_v3 = vmul.f32 %v1693_v47, %v411_v51  ;;  %v415_v5 = vmul.f32 %v1694_v50, %v411_v51  ;;  %v2220_v50 = vld [vmem:[%s3506_s7 + $0x28] sm:$0xff]  ;;  %v1718_v56 = vld [vmem:[%s3525_s2 + $0x2b0] sm:$0xff] }
  0x42   :  { %v402_v7 = vadd.f32 %v398_v58, %v387_v53  ;;  %v403_v8 = vadd.f32 %v399_v59, %v388_v54  ;;  %v404_v9 = vadd.f32 %v400_v60, %v389_v55  ;;  %v427_v10 = vmul.f32 %v1696_v57, %v426_v52  ;;  %v1717_v55 = vld [vmem:[%s3525_s2 + $0x2a8] sm:$0xff]  ;;  %v1719_v57 = vld [vmem:[%s3525_s2 + $0x2b8] sm:$0xff] }
  0x43   :  { %v416_v14 = vadd.f32 %v412_v61, %v401_v1  ;;  %v428_v15 = vmul.f32 %v1697_v62, %v426_v52  ;;  %v429_v16 = vmul.f32 %v1698_v63, %v426_v52  ;;  %v430_v17 = vmul.f32 %v1699_v0, %v426_v52 }
  0x44   :  { %v417_v19 = vadd.f32 %v413_v2, %v402_v7  ;;  %v418_v20 = vadd.f32 %v414_v3, %v403_v8  ;;  %v419_v21 = vadd.f32 %v415_v5, %v404_v9  ;;  %v441_v22 = vstv %s2786_s0  ;;  %s2869_s0 = sld [smem:[#allocation2 + $0x17]]  ;;  %v1721_v2 = vld [vmem:[%s3525_s2 + $0x2c0] sm:$0xff]  ;;  %v1722_v3 = vld [vmem:[%s3525_s2 + $0x2c8] sm:$0xff]  ;;  %v1723_v5 = vld [vmem:[%s3525_s2 + $0x2d0] sm:$0xff]  ;;  %770 = vmatpush.bf16.msra.mxu1 %v2220_v50 }
  0x45   :  { %v431_v26 = vadd.f32 %v427_v10, %v416_v14  ;;  %v442_v27 = vmul.f32 %v1701_v6, %v441_v22  ;;  %v443_v28 = vmul.f32 %v1702_v11, %v441_v22  ;;  %v444_v29 = vmul.f32 %v1703_v12, %v441_v22  ;;  %v1724_v10 = vld [vmem:[%s3525_s2 + $0x2d8] sm:$0xff]  ;;  %v2219_v11 = vld [vmem:[%s3506_s7 + $0x20] sm:$0xff] }
  0x46   :  { %v432_v33 = vadd.f32 %v428_v15, %v417_v19  ;;  %v433_v34 = vadd.f32 %v429_v16, %v418_v20  ;;  %v434_v35 = vadd.f32 %v430_v17, %v419_v21  ;;  %v445_v36 = vmul.f32 %v1704_v18, %v441_v22  ;;  %v1726_v16 = vld [vmem:[%s3525_s2 + $0x2e0] sm:$0xff]  ;;  %v1727_v21 = vld [vmem:[%s3525_s2 + $0x2e8] sm:$0xff]  ;;  %v1728_v22 = vld [vmem:[%s3525_s2 + $0x2f0] sm:$0xff] }
  0x47   :  { %v446_v40 = vadd.f32 %v442_v27, %v431_v26  ;;  %v456_v41 = vstv %s2797_s1  ;;  %v471_v43 = vstv %s2805_s25  ;;  %v486_v44 = vstv %s2810_s26 }
  0x48   :  { %v447_v45 = vadd.f32 %v443_v28, %v432_v33  ;;  %v448_v46 = vadd.f32 %v444_v29, %v433_v34  ;;  %v449_v47 = vadd.f32 %v445_v36, %v434_v35  ;;  %v457_v48 = vmul.f32 %v1706_v23, %v456_v41  ;;  %v1729_v23 = vld [vmem:[%s3525_s2 + $0x2f8] sm:$0xff]  ;;  %v1731_v29 = vld [vmem:[%s3525_s2 + $0x300] sm:$0xff]  ;;  %771 = vmatpush.bf16.msra.mxu1 %v2219_v11 }
  0x49   :  { %v458_v51 = vmul.f32 %v1707_v30, %v456_v41  ;;  %v459_v52 = vmul.f32 %v1708_v31, %v456_v41  ;;  %v460_v53 = vmul.f32 %v1709_v32, %v456_v41  ;;  %v472_v54 = vmul.f32 %v1711_v37, %v471_v43  ;;  %v1732_v30 = vld [vmem:[%s3525_s2 + $0x308] sm:$0xff]  ;;  %v1733_v31 = vld [vmem:[%s3525_s2 + $0x310] sm:$0xff]  ;;  %v1734_v34 = vld [vmem:[%s3525_s2 + $0x318] sm:$0xff] }
  0x4a   :  { %v461_v58 = vadd.f32 %v457_v48, %v446_v40  ;;  %v473_v59 = vmul.f32 %v1712_v38, %v471_v43  ;;  %v474_v60 = vmul.f32 %v1713_v39, %v471_v43  ;;  %v475_v61 = vmul.f32 %v1714_v42, %v471_v43  ;;  %v2218_v36 = vld [vmem:[%s3506_s7 + $0x18] sm:$0xff] }
  0x4b   :  { %v462_v62 = vadd.f32 %v458_v51, %v447_v45  ;;  %v463_v63 = vadd.f32 %v459_v52, %v448_v46  ;;  %v464_v0 = vadd.f32 %v460_v53, %v449_v47  ;;  %v487_v1 = vmul.f32 %v1716_v49, %v486_v44  ;;  %v79_v45 = vld [vmem:[%s3502_s3 + $0x20] sm:$0x1]  ;;  %v2217_v53 = vld [vmem:[%s3506_s7 + $0x10] sm:$0xff]  ;;  %v2226_v11 = vld [vmem:[%s3506_s7 + $0x58] sm:$0xff] }
  0x4c   :  { %v476_v6 = vadd.f32 %v472_v54, %v461_v58  ;;  %v488_v7 = vmul.f32 %v1717_v55, %v486_v44  ;;  %v489_v8 = vmul.f32 %v1718_v56, %v486_v44  ;;  %v490_v9 = vmul.f32 %v1719_v57, %v486_v44  ;;  %772 = vmatpush.bf16.msra.mxu1 %v2218_v36 }
  0x4d   :  { %v477_v12 = vadd.f32 %v473_v59, %v462_v62  ;;  %v478_v13 = vadd.f32 %v474_v60, %v463_v63  ;;  %v479_v14 = vadd.f32 %v475_v61, %v464_v0  ;;  %v501_v15 = vstv %s2852_s29  ;;  %v1611_v62 = vld [vmem:[%s3502_s3 + $0x8] sm:$0xf]  ;;  %v2206_v63 = vld [vmem:[%s3502_s3 + $0x10] sm:$0xf0] }
  0x4e   :  { %v491_v17 = vadd.f32 %v487_v1, %v476_v6  ;;  %v502_v18 = vmul.f32 %v1721_v2, %v501_v15  ;;  %v503_v19 = vmul.f32 %v1722_v3, %v501_v15  ;;  %v504_v20 = vmul.f32 %v1723_v5, %v501_v15  ;;  %v2230_v6 = vld [vmem:[%s3506_s7 + $0x78] sm:$0xff] }
  0x4f   :  { %v492_v24 = vadd.f32 %v488_v7, %v477_v12  ;;  %v493_v26 = vadd.f32 %v489_v8, %v478_v13  ;;  %v494_v27 = vadd.f32 %v490_v9, %v479_v14  ;;  %v505_v28 = vmul.f32 %v1724_v10, %v501_v15  ;;  %v2229_v9 = vld [vmem:[%s3506_s7 + $0x70] sm:$0xff]  ;;  %v2227_v10 = vld [vmem:[%s3506_s7 + $0x60] sm:$0xff]  ;;  %v2216_v12 = vld [vmem:[%s3506_s7 + $0x8] sm:$0xff] }
  0x50   :  { %v506_v32 = vadd.f32 %v502_v18, %v491_v17  ;;  %v516_v33 = vstv %s2869_s0  ;;  %v531_v35 = vstv %s2874_s5  ;;  %v102_v55 = vunpack.c.l.b16 %v79_v45  ;;  %773 = vmatpush.bf16.msra.mxu1 %v2217_v53  ;;  %v2215_v13 = vld [vmem:[%s3506_s7] sm:$0xff]  ;;  %v1957_v14 = vld [vmem:[%s3508_s9 + $0x70] sm:$0xf] }
  0x51   :  { %v507_v37 = vadd.f32 %v503_v19, %v492_v24  ;;  %v508_v38 = vadd.f32 %v504_v20, %v493_v26  ;;  %v509_v39 = vadd.f32 %v505_v28, %v494_v27  ;;  %v517_v40 = vmul.f32 %v1726_v16, %v516_v33  ;;  %v2246_v15 = vld [vmem:[%s3508_s9 + $0x74] sm:$0xf0]  ;;  %v1949_v16 = vld [vmem:[%s3508_s9 + $0x60] sm:$0xf]  ;;  %v2224_v18 = vld [vmem:[%s3506_s7 + $0x48] sm:$0xff] }
  0x52   :  { %v518_v41 = vmul.f32 %v1727_v21, %v516_v33  ;;  %v519_v42 = vmul.f32 %v1728_v22, %v516_v33  ;;  %v520_v43 = vmul.f32 %v1729_v23, %v516_v33  ;;  %v532_v44 = vmul.f32 %v1731_v29, %v531_v35  ;;  %v2244_v19 = vld [vmem:[%s3508_s9 + $0x64] sm:$0xf0]  ;;  %v2021_v21 = vld [vmem:[%s3508_s9 + $0xf0] sm:$0xf]  ;;  %v2262_v22 = vld [vmem:[%s3508_s9 + $0xf4] sm:$0xf0] }
  0x53   :  { %v521_v46 = vadd.f32 %v517_v40, %v506_v32  ;;  %v533_v47 = vmul.f32 %v1732_v30, %v531_v35  ;;  %v534_v48 = vmul.f32 %v1733_v31, %v531_v35  ;;  %v535_v49 = vmul.f32 %v1734_v34, %v531_v35  ;;  %v1941_v23 = vld [vmem:[%s3508_s9 + $0x50] sm:$0xf]  ;;  %v2242_v24 = vld [vmem:[%s3508_s9 + $0x54] sm:$0xf0]  ;;  %v2223_v26 = vld [vmem:[%s3506_s7 + $0x40] sm:$0xff] }
  0x54   :  { %v522_v50 = vadd.f32 %v518_v41, %v507_v37  ;;  %v523_v51 = vadd.f32 %v519_v42, %v508_v38  ;;  %v524_v52 = vadd.f32 %v520_v43, %v509_v39  ;;  %v108_v59 = vpack.c.b16 %v102_v55, %v102_v55  ;;  %774 = vmatpush.bf16.msra.mxu1 %v2216_v12  ;;  %v2013_v29 = vld [vmem:[%s3508_s9 + $0xe0] sm:$0xf]  ;;  %v2260_v30 = vld [vmem:[%s3508_s9 + $0xe4] sm:$0xf0]  ;;  %v2005_v39 = vld [vmem:[%s3508_s9 + $0xd0] sm:$0xf] }
  0x55   :  { %v536_v54 = vadd.f32 %v532_v44, %v521_v46  ;;  %v544_v0 = vstv %s2933_s28  ;;  %v1612_v3 = vor.u32 %v2206_v63, %v1611_v62  ;;  %v1958_v17 = vor.u32 %v2246_v15, %v1957_v14  ;;  %v1933_v31 = vld [vmem:[%s3508_s9 + $0x40] sm:$0xf]  ;;  %v2240_v32 = vld [vmem:[%s3508_s9 + $0x44] sm:$0xf0]  ;;  %v2258_v40 = vld [vmem:[%s3508_s9 + $0xd4] sm:$0xf0] }
  0x56   :  { %v537_v56 = vadd.f32 %v533_v47, %v522_v50  ;;  %v538_v57 = vadd.f32 %v534_v48, %v523_v51  ;;  %v539_v58 = vadd.f32 %v535_v49, %v524_v52  ;;  %v126_v1 = vand.u32 %v2446_v4, %v108_v59  ;;  %v2228_v4 = vld [vmem:[%s3506_s7 + $0x68] sm:$0xff]  ;;  %v1925_v42 = vld [vmem:[%s3508_s9 + $0x30] sm:$0xf]  ;;  %v2238_v43 = vld [vmem:[%s3508_s9 + $0x34] sm:$0xf0] }
  0x57   :  { %v1950_v20 = vor.u32 %v2244_v19, %v1949_v16  ;;  %v2022_v27 = vor.u32 %v2262_v22, %v2021_v21  ;;  %v1942_v28 = vor.u32 %v2242_v24, %v1941_v23  ;;  %v2014_v33 = vor.u32 %v2260_v30, %v2013_v29  ;;  %v1997_v45 = vld [vmem:[%s3508_s9 + $0xc0] sm:$0xf]  ;;  %v2256_v46 = vld [vmem:[%s3508_s9 + $0xc4] sm:$0xf0]  ;;  %v1989_v51 = vld [vmem:[%s3508_s9 + $0xb0] sm:$0xf] }
  0x58   :  { %v540_v60 = vmax.f32 %v536_v54, %v537_v56  ;;  %v541_v61 = vmax.f32 %v538_v57, %v539_v58  ;;  %160 = vmatpush.bf16.msra.mxu2 %v126_v1  ;;  %775 = vmatpush.bf16.msra.mxu1 %v2215_v13  ;;  %v1934_v34 = vor.u32 %v2240_v32, %v1933_v31  ;;  %v1917_v48 = vld [vmem:[%s3508_s9 + $0x20] sm:$0xf]  ;;  %v2236_v49 = vld [vmem:[%s3508_s9 + $0x24] sm:$0xf0]  ;;  %v2254_v52 = vld [vmem:[%s3508_s9 + $0xb4] sm:$0xf0] }
  0x59   :  { %v2006_v41 = vor.u32 %v2258_v40, %v2005_v39  ;;  %v1926_v44 = vor.u32 %v2238_v43, %v1925_v42  ;;  %v1998_v47 = vor.u32 %v2256_v46, %v1997_v45  ;;  %v1918_v50 = vor.u32 %v2236_v49, %v1917_v48  ;;  %v1909_v54 = vld [vmem:[%s3508_s9 + $0x10] sm:$0xf]  ;;  %v2234_v55 = vld [vmem:[%s3508_s9 + $0x14] sm:$0xf0]  ;;  %v1981_v57 = vld [vmem:[%s3508_s9 + $0xa0] sm:$0xf] }
  0x5a   :  { %v542_v2 = vmax.f32 %v540_v60, %v541_v61  ;;  %v1990_v53 = vor.u32 %v2254_v52, %v1989_v51  ;;  %v1910_v56 = vor.u32 %v2234_v55, %v1909_v54  ;;  %v2252_v58 = vld [vmem:[%s3508_s9 + $0xa4] sm:$0xf0]  ;;  %v1901_v60 = vld [vmem:[%s3508_s9] sm:$0xf]  ;;  %v1973_v63 = vld [vmem:[%s3508_s9 + $0x90] sm:$0xf] }
  0x5b   :  { %v1982_v59 = vor.u32 %v2252_v58, %v1981_v57  ;;  %v2232_v61 = vld [vmem:[%s3508_s9 + $0x4] sm:$0xf0]  ;;  %v2261_v15 = vld [vmem:[%s3508_s9 + $0xf4] sm:$0xf]  ;;  %v2023_v16 = vld [vmem:[%s3508_s9 + $0xf8] sm:$0xf0] }
  0x5c   :  { %v545_v5 = vadd.f32 %v544_v0, %v542_v2  ;;  %161 = vmatpush.bf16.msra.mxu2 %v1612_v3  ;;  %1209 = vmatpush.bf16.msrb.mxu1 %v1958_v17  ;;  %v1902_v62 = vor.u32 %v2232_v61, %v1901_v60  ;;  %v2250_v0 = vld [vmem:[%s3508_s9 + $0x94] sm:$0xf0]  ;;  %v1965_v2 = vld [vmem:[%s3508_s9 + $0x80] sm:$0xf]  ;;  %v2248_v3 = vld [vmem:[%s3508_s9 + $0x84] sm:$0xf0] }
  0x5d   :  { %v1974_v1 = vor.u32 %v2250_v0, %v1973_v63  ;;  %v2259_v22 = vld [vmem:[%s3508_s9 + $0xe4] sm:$0xf]  ;;  %v2015_v23 = vld [vmem:[%s3508_s9 + $0xe8] sm:$0xf0]  ;;  %v2294_v39 = vld [vmem:[%s3509_s10 + $0x74] sm:$0xf0] }
  0x5e   :  { %v546_v7 = vmax.f32 %v545_v5, 0.0  ;;  %v1966_v5 = vor.u32 %v2248_v3, %v1965_v2  ;;  %v2275_v29 = vld [vmem:[%s3508_s9 + $0x164] sm:$0xf]  ;;  %v2018_v32 = vor.u32 %v2259_v22, %v2015_v23  ;;  %v2293_v40 = vld [vmem:[%s3509_s10 + $0x74] sm:$0xf] }
  0x5f   :  { %1615 = vmatmul.msk.bf16.vlgmr.msra.gmra.mxu2 %vm112_vm1, %v2491_v25  ;;  %v2225_v25 = vld [vmem:[%s3506_s7 + $0x50] sm:$0xff]  ;;  %v2071_v43 = vld [vmem:[%s3508_s9 + $0x158] sm:$0xf0]  ;;  %v2292_v48 = vld [vmem:[%s3509_s10 + $0x64] sm:$0xf0] }
  0x60   :  { %v547_v8 = vpack.c.bf16 %v546_v7, %v546_v7  ;;  %781 = vmatpush.bf16.msrb.mxu2 %v2230_v6  ;;  %1210 = vmatpush.bf16.msrb.mxu1 %v1950_v20  ;;  %v556_v6 = vld [vmem:[%s3505_s6] sm:$0x3]  ;;  %v2026_v20 = vor.u32 %v2261_v15, %v2023_v16  ;;  %v2273_v42 = vld [vmem:[%s3508_s9 + $0x154] sm:$0xf]  ;;  %v1895_v45 = vld [vmem:[%s3509_s10 + $0x78] sm:$0xf0] }
  0x61   :  { %v559_v7 = vperm.slane %v556_v6, 1  ;;  %v1898_v46 = vor.u32 %v2293_v40, %v1895_v45  ;;  %v2291_v49 = vld [vmem:[%s3509_s10 + $0x64] sm:$0xf]  ;;  %v1887_v54 = vld [vmem:[%s3509_s10 + $0x68] sm:$0xf0]  ;;  %v2074_v58 = vor.u32 %v2273_v42, %v2071_v43 }
  0x62   :  { %1769 = vmatmul.msk.bf16.vlgmr.msrb.gmra.mxu3 %vm602_vm2, %v547_v8  ;;  %1770 = vmatmul.msk.bf16.vlgmr.msrb.gmra.mxu0 %vm602_vm2, %v547_v8  ;;  %v2255_v52 = vld [vmem:[%s3508_s9 + $0xc4] sm:$0xf]  ;;  %v1999_v55 = vld [vmem:[%s3508_s9 + $0xc8] sm:$0xf0]  ;;  %v2290_v57 = vld [vmem:[%s3509_s10 + $0x54] sm:$0xf0] }
  0x63   :  { %956 = vmatpush.bf16.msra.mxu0 %v1898_v46  ;;  %v1879_v60 = vld [vmem:[%s3509_s10 + $0x58] sm:$0xf0]  ;;  %v2063_v63 = vld [vmem:[%s3508_s9 + $0x148] sm:$0xf0]  ;;  %v2002_v2 = vor.u32 %v2255_v52, %v1999_v55  ;;  %v2253_v3 = vld [vmem:[%s3508_s9 + $0xb4] sm:$0xf] }
  0x64   :  { %782 = vmatpush.bf16.msrb.mxu2 %v2229_v9  ;;  %1211 = vmatpush.bf16.msrb.mxu1 %v1942_v28  ;;  %v2087_v28 = vld [vmem:[%s3508_s9 + $0x178] sm:$0xf0]  ;;  %v2251_v15 = vld [vmem:[%s3508_s9 + $0xa4] sm:$0xf]  ;;  %v2285_v23 = vld [vmem:[%s3509_s10 + $0x34] sm:$0xf] }
  0x65   :  { %v1855_v40 = vld [vmem:[%s3509_s10 + $0x28] sm:$0xf0]  ;;  %v2247_v43 = vld [vmem:[%s3508_s9 + $0x84] sm:$0xf] }
  0x66   :  { %v1967_v45 = vld [vmem:[%s3508_s9 + $0x88] sm:$0xf0]  ;;  %v2263_v52 = vld [vmem:[%s3508_s9 + $0x104] sm:$0xf] }
  0x68   :  { %783 = vmatpush.bf16.msrb.mxu2 %v2228_v4  ;;  %1212 = vmatpush.bf16.msrb.mxu1 %v1934_v34  ;;  %v3087_v4 = vld [vmem:[%s3503_s4] sm:$0x7]  ;;  %v2007_v34 = vld [vmem:[%s3508_s9 + $0xd8] sm:$0xf0] }
  0x69   :  { %v83_v12 = vperm.slane %v3087_v4, 1  ;;  %v82_v24 = vperm.slane %v3087_v4, 0 }
  0x6c   :  { %784 = vmatpush.bf16.msrb.mxu2 %v2227_v10  ;;  %1213 = vmatpush.bf16.msrb.mxu1 %v1926_v44 }
  0x70   :  { %785 = vmatpush.bf16.msrb.mxu2 %v2226_v11  ;;  %1214 = vmatpush.bf16.msrb.mxu1 %v1918_v50  ;;  %v558_v11 = vperm.slane %v556_v6, 0  ;;  %v1991_v6 = vld [vmem:[%s3508_s9 + $0xb8] sm:$0xf0] }
  0x74   :  { %786 = vmatpush.bf16.msrb.mxu2 %v2225_v25  ;;  %1215 = vmatpush.bf16.msrb.mxu1 %v1910_v56  ;;  %v1890_v56 = vor.u32 %v2291_v49, %v1887_v54  ;;  %v2282_v49 = vld [vmem:[%s3509_s10 + $0x14] sm:$0xf0]  ;;  %v1970_v54 = vor.u32 %v2247_v43, %v1967_v45  ;;  %v2029_v45 = vld [vmem:[%s3508_s9 + $0x100] sm:$0xf] }
  0x76   :  { %957 = vmatpush.bf16.msra.mxu0 %v1890_v56 }
  0x78   :  { %787 = vmatpush.bf16.msrb.mxu2 %v2224_v18  ;;  %1216 = vmatpush.bf16.msrb.mxu1 %v1902_v62  ;;  %v2271_v62 = vld [vmem:[%s3508_s9 + $0x144] sm:$0xf] }
  0x7c   :  { %788 = vmatpush.bf16.msrb.mxu2 %v2223_v26 }
  0x80   :  { %1222 = vmatpush.bf16.msra.mxu2 %v2022_v27  ;;  %v2277_v27 = vld [vmem:[%s3508_s9 + $0x174] sm:$0xf] }
  0x84   :  { %1223 = vmatpush.bf16.msra.mxu2 %v2014_v33  ;;  %v2257_v33 = vld [vmem:[%s3508_s9 + $0xd4] sm:$0xf] }
  0x85   :  { %v2010_v51 = vor.u32 %v2257_v33, %v2007_v34  ;;  %v84_v33 = vperm.slane %v3087_v4, 2  ;;  %v2265_v4 = vld [vmem:[%s3508_s9 + $0x114] sm:$0xf] }
  0x88   :  { %1224 = vmatpush.bf16.msra.mxu2 %v2006_v41 }
  0x8c   :  { %1225 = vmatpush.bf16.msra.mxu2 %v1998_v47  ;;  %v1885_v47 = vld [vmem:[%s3509_s10 + $0x60] sm:$0xf] }
  0x90   :  { %1226 = vmatpush.bf16.msra.mxu2 %v1990_v53  ;;  %v1886_v53 = vor.u32 %v2292_v48, %v1885_v47  ;;  %v1845_v48 = vld [vmem:[%s3509_s10 + $0x10] sm:$0xf] }
  0x91   :  { %v1846_v55 = vor.u32 %v2282_v49, %v1845_v48  ;;  %v2231_v48 = vld [vmem:[%s3508_s9 + $0x4] sm:$0xf]  ;;  %v1903_v49 = vld [vmem:[%s3508_s9 + $0x8] sm:$0xf0] }
  0x94   :  { %1227 = vmatpush.bf16.msra.mxu2 %v1982_v59  ;;  %v2289_v59 = vld [vmem:[%s3509_s10 + $0x54] sm:$0xf] }
  0x98   :  { %1228 = vmatpush.bf16.msra.mxu2 %v1974_v1 }
  0x9b   :  { %v3019_v35 = vpop.f32.mrf.mxu0 }
  0x9c   :  { %1229 = vmatpush.bf16.msra.mxu2 %v1966_v5  ;;  %v138_v50 = vadd.f32 %v3019_v35, %v82_v24  ;;  %v1877_v35 = vld [vmem:[%s3509_s10 + $0x50] sm:$0xf]  ;;  %v1863_v24 = vld [vmem:[%s3509_s10 + $0x38] sm:$0xf0] }
  0x9d   :  { %v1878_v5 = vor.u32 %v2290_v57, %v1877_v35  ;;  %v1866_v34 = vor.u32 %v2285_v23, %v1863_v24  ;;  %v1837_v57 = vld [vmem:[%s3509_s10] sm:$0xf]  ;;  %v1935_v24 = vld [vmem:[%s3508_s9 + $0x48] sm:$0xf0] }
  0x9e   :  { %v167_v1 = vmax.f32 %v138_v50, 0.0 }
  0xa1   :  { %v150_v36 = vpop.f32.mrf.mxu3 }
  0xa2   :  { %v151_v17 = vadd.f32 %v150_v36, %v83_v12  ;;  %v2090_v36 = vor.u32 %v2277_v27, %v2087_v28  ;;  %v1871_v12 = vld [vmem:[%s3509_s10 + $0x48] sm:$0xf0] }
  0xa3   :  { %v139_v37 = vpop.f32.mrf.mxu0  ;;  %v2047_v27 = vld [vmem:[%s3508_s9 + $0x128] sm:$0xf0] }
  0xa4   :  { %v168_v26 = vmax.f32 %v151_v17, 0.0  ;;  %v2079_v37 = vld [vmem:[%s3508_s9 + $0x168] sm:$0xf0]  ;;  %v3208_v17 = vpack.c.bf16 %v167_v1, %v167_v1  ;;  %v2245_v1 = vld [vmem:[%s3508_s9 + $0x74] sm:$0xf] }
  0xa5   :  { %v2082_v41 = vor.u32 %v2275_v29, %v2079_v37  ;;  %v2249_v29 = vld [vmem:[%s3508_s9 + $0x94] sm:$0xf]  ;;  %v2284_v37 = vld [vmem:[%s3509_s10 + $0x24] sm:$0xf0] }
  0xa6   :  { %v3172_v61 = vpack.c.bf16 %v168_v26, %v168_v26  ;;  %v2267_v26 = vld [vmem:[%s3508_s9 + $0x124] sm:$0xf] }
  0xa9   :  { %v152_v38 = vpop.f32.mrf.mxu3 }
  0xaa   :  { %v1893_v38 = vld [vmem:[%s3509_s10 + $0x70] sm:$0xf] }
  0xab   :  { %v1894_v44 = vor.u32 %v2294_v39, %v1893_v38  ;;  %v2050_v38 = vor.u32 %v2267_v26, %v2047_v27  ;;  %v2283_v39 = vld [vmem:[%s3509_s10 + $0x24] sm:$0xf]  ;;  %v2053_v27 = vld [vmem:[%s3508_s9 + $0x130] sm:$0xf] }
  0xac   :  { %v1858_v47 = vor.u32 %v2283_v39, %v1855_v40  ;;  %v1919_v39 = vld [vmem:[%s3508_s9 + $0x28] sm:$0xf0] }
  0xad   :  { %943 = vmatpush.bf16.msra.mxu3 %v1894_v44 }
  0xb1   :  { %944 = vmatpush.bf16.msra.mxu3 %v1886_v53  ;;  %v2031_v53 = vld [vmem:[%s3508_s9 + $0x108] sm:$0xf0] }
  0xb5   :  { %945 = vmatpush.bf16.msra.mxu3 %v1878_v5 }
  0xdf   :  { %v628_v8 = vpop.f32.mrf.mxu0 }
  0xe0   :  { %v629_v9 = vadd.f32 %v628_v8, %v559_v7  ;;  %v1882_v7 = vor.u32 %v2289_v59, %v1879_v60  ;;  %v1869_v8 = vld [vmem:[%s3509_s10 + $0x40] sm:$0xf]  ;;  %v2034_v59 = vor.u32 %v2263_v52, %v2031_v53  ;;  %v2279_v60 = vld [vmem:[%s3509_s10 + $0x4] sm:$0xf] }
  0xe2   :  { %v633_v10 = vmax.f32 %v629_v9, 0.0  ;;  %v3112_v30 = vpop.f32.mrf.mxu2  ;;  %v2288_v9 = vld [vmem:[%s3509_s10 + $0x44] sm:$0xf0]  ;;  %958 = vmatpush.bf16.msra.mxu0 %v1882_v7 }
  0xe3   :  { %v1870_v16 = vor.u32 %v2288_v9, %v1869_v8  ;;  %v164_v46 = vadd.f32 %v3112_v30, %v84_v33  ;;  %v1847_v30 = vld [vmem:[%s3509_s10 + $0x18] sm:$0xf0]  ;;  %v2077_v9 = vld [vmem:[%s3508_s9 + $0x160] sm:$0xf] }
  0xe4   :  { %v635_v25 = vpack.c.bf16 %v633_v10, %v633_v10  ;;  %v2066_v10 = vor.u32 %v2271_v62, %v2063_v63  ;;  %v1839_v62 = vld [vmem:[%s3509_s10 + $0x8] sm:$0xf0]  ;;  %v2085_v63 = vld [vmem:[%s3508_s9 + $0x170] sm:$0xf] }
  0xe5   :  { %v615_v13 = vpop.f32.mrf.mxu3  ;;  %946 = vmatpush.bf16.msra.mxu3 %v1870_v16  ;;  %v169_v56 = vmax.f32 %v164_v46, 0.0  ;;  %v2264_v46 = vld [vmem:[%s3508_s9 + $0x104] sm:$0xf0] }
  0xe6   :  { %v616_v14 = vadd.f32 %v615_v13, %v558_v11  ;;  %789 = vmatmul.bf16.vlgmr.msrb.gmra.mxu2 %v635_v25  ;;  %v2287_v11 = vld [vmem:[%s3509_s10 + $0x44] sm:$0xf]  ;;  %v2269_v25 = vld [vmem:[%s3508_s9 + $0x134] sm:$0xf]  ;;  %v2055_v13 = vld [vmem:[%s3508_s9 + $0x138] sm:$0xf0] }
  0xe7   :  { %v630_v18 = vpop.f32.mrf.mxu0  ;;  %1274 = vmatpush.bf16.msrb.mxu2 %v2090_v36  ;;  %v2058_v22 = vor.u32 %v2269_v25, %v2055_v13  ;;  %v1853_v36 = vld [vmem:[%s3509_s10 + $0x20] sm:$0xf]  ;;  %v3306_v5 = vpack.c.bf16 %v169_v56, %v169_v56  ;;  %v2069_v13 = vld [vmem:[%s3508_s9 + $0x150] sm:$0xf] }
  0xe8   :  { %v632_v19 = vmax.f32 %v616_v14, 0.0  ;;  %v1994_v14 = vor.u32 %v2253_v3, %v1991_v6  ;;  %v1983_v18 = vld [vmem:[%s3508_s9 + $0xa8] sm:$0xf0]  ;;  %v1854_v44 = vor.u32 %v2284_v37, %v1853_v36  ;;  %v1842_v6 = vor.u32 %v2279_v60, %v1839_v62  ;;  %v2268_v36 = vld [vmem:[%s3508_s9 + $0x124] sm:$0xf0]  ;;  %v2310_v62 = vld [vmem:[%s3511_s12 + $0x78] sm:$0xff] }
  0xe9   :  { %v1986_v28 = vor.u32 %v2251_v15, %v1983_v18  ;;  %v2241_v15 = vld [vmem:[%s3508_s9 + $0x54] sm:$0xf]  ;;  %v1943_v18 = vld [vmem:[%s3508_s9 + $0x58] sm:$0xf0]  ;;  %v2235_v37 = vld [vmem:[%s3508_s9 + $0x24] sm:$0xf] }
  0xea   :  { %v634_v21 = vpack.c.bf16 %v632_v19, %v632_v19  ;;  %v165_v0 = vpop.f32.mrf.mxu2  ;;  %v1874_v19 = vor.u32 %v2287_v11, %v1871_v12  ;;  %v2243_v11 = vld [vmem:[%s3508_s9 + $0x64] sm:$0xf]  ;;  %v1951_v12 = vld [vmem:[%s3508_s9 + $0x68] sm:$0xf0]  ;;  %v1922_v40 = vor.u32 %v2235_v37, %v1919_v39 }
  0xeb   :  { %1275 = vmatpush.bf16.msrb.mxu2 %v2082_v41  ;;  %v2039_v41 = vld [vmem:[%s3508_s9 + $0x118] sm:$0xf0]  ;;  %v2278_v0 = vld [vmem:[%s3508_s9 + $0x174] sm:$0xf0] }
  0xec   :  { %776 = vmatmul.bf16.vlgmr.msra.gmra.mxu1 %v634_v21  ;;  %v2286_v21 = vld [vmem:[%s3509_s10 + $0x34] sm:$0xf0]  ;;  %959 = vmatpush.bf16.msra.mxu0 %v1874_v19  ;;  %v2042_v50 = vor.u32 %v2265_v4, %v2039_v41  ;;  %v2086_v7 = vor.u32 %v2278_v0, %v2085_v63  ;;  %v1946_v19 = vor.u32 %v2241_v15, %v1943_v18  ;;  %v2037_v4 = vld [vmem:[%s3508_s9 + $0x110] sm:$0xf]  ;;  %v2296_v15 = vld [vmem:[%s3511_s12 + $0x8] sm:$0xff] }
  0xed   :  { %v617_v31 = vpop.f32.mrf.mxu3  ;;  %1261 = vmatpush.bf16.msra.mxu1 %v2026_v20  ;;  %v1861_v20 = vld [vmem:[%s3509_s10 + $0x30] sm:$0xf]  ;;  %v2266_v41 = vld [vmem:[%s3508_s9 + $0x114] sm:$0xf0]  ;;  %v2295_v18 = vld [vmem:[%s3511_s12] sm:$0xff] }
  0xee   :  { %v1975_v31 = vld [vmem:[%s3508_s9 + $0x98] sm:$0xf0]  ;;  %v2038_v43 = vor.u32 %v2266_v41, %v2037_v4 }
  0xef   :  { %1276 = vmatpush.bf16.msrb.mxu2 %v2074_v58  ;;  %v1978_v42 = vor.u32 %v2249_v29, %v1975_v31  ;;  %v2280_v58 = vld [vmem:[%s3509_s10 + $0x4] sm:$0xf0]  ;;  %v2237_v29 = vld [vmem:[%s3508_s9 + $0x34] sm:$0xf] }
  0xf0   :  { %960 = vmatpush.bf16.msra.mxu0 %v1866_v34  ;;  %v1838_v3 = vor.u32 %v2280_v58, %v1837_v57  ;;  %v2045_v34 = vld [vmem:[%s3508_s9 + $0x120] sm:$0xf] }
  0xf1   :  { %1262 = vmatpush.bf16.msra.mxu1 %v2018_v32  ;;  %v1862_v32 = vor.u32 %v2286_v21, %v1861_v20  ;;  %v2061_v20 = vld [vmem:[%s3508_s9 + $0x140] sm:$0xf]  ;;  %v2272_v21 = vld [vmem:[%s3508_s9 + $0x144] sm:$0xf0] }
  0xf2   :  { %v2062_v23 = vor.u32 %v2272_v21, %v2061_v20  ;;  %v2317_v21 = vld [vmem:[%s3513_s14 + $0x30] sm:$0xff] }
  0xf3   :  { %1277 = vmatpush.bf16.msrb.mxu2 %v2066_v10  ;;  %947 = vmatpush.bf16.msra.mxu3 %v1862_v32  ;;  %v2276_v10 = vld [vmem:[%s3508_s9 + $0x164] sm:$0xf0]  ;;  %v1927_v32 = vld [vmem:[%s3508_s9 + $0x38] sm:$0xf0] }
  0xf4   :  { %961 = vmatpush.bf16.msra.mxu0 %v1858_v47  ;;  %v2078_v25 = vor.u32 %v2276_v10, %v2077_v9  ;;  %v1930_v33 = vor.u32 %v2237_v29, %v1927_v32  ;;  %v2301_v9 = vld [vmem:[%s3511_s12 + $0x30] sm:$0xff]  ;;  %v2307_v10 = vld [vmem:[%s3511_s12 + $0x60] sm:$0xff] }
  0xf5   :  { %1263 = vmatpush.bf16.msra.mxu1 %v2010_v51  ;;  %v2281_v51 = vld [vmem:[%s3509_s10 + $0x14] sm:$0xf]  ;;  %v1287_v29 = vld [vmem:[%s3510_s11] sm:$0x3] }
  0xf6   :  { %1230 = vmatmul.bf16.vlgmr.msra.gmra.mxu2 %v3172_v61  ;;  %v1850_v35 = vor.u32 %v2281_v51, %v1847_v30  ;;  %v1906_v51 = vor.u32 %v2231_v48, %v1903_v49  ;;  %v2325_v30 = vld [vmem:[%s3507_s8] ss:$0 sm:$0xff]  ;;  %v2314_v48 = vld [vmem:[%s3513_s14 + $0x18] sm:$0xff]  ;;  %v2313_v49 = vld [vmem:[%s3513_s14 + $0x10] sm:$0xff] }
  0xf7   :  { %1278 = vmatpush.bf16.msrb.mxu2 %v2058_v22  ;;  %948 = vmatpush.bf16.msra.mxu3 %v1854_v44  ;;  %v2239_v22 = vld [vmem:[%s3508_s9 + $0x44] sm:$0xf]  ;;  %v1911_v44 = vld [vmem:[%s3508_s9 + $0x18] sm:$0xf0] }
  0xf8   :  { %962 = vmatpush.bf16.msra.mxu0 %v1850_v35  ;;  %v1938_v26 = vor.u32 %v2239_v22, %v1935_v24  ;;  %v2316_v22 = vld [vmem:[%s3513_s14 + $0x28] sm:$0xff] }
  0xf9   :  { %1264 = vmatpush.bf16.msra.mxu1 %v2002_v2  ;;  %v1959_v2 = vld [vmem:[%s3508_s9 + $0x78] sm:$0xf0] }
  0xfa   :  { %v1962_v8 = vor.u32 %v2245_v1, %v1959_v2 }
  0xfb   :  { %1279 = vmatpush.bf16.msrb.mxu2 %v2050_v38  ;;  %949 = vmatpush.bf16.msra.mxu3 %v1846_v55  ;;  %v2046_v38 = vor.u32 %v2268_v36, %v2045_v34  ;;  %v1290_v34 = vperm.slane %v1287_v29, 1 }
  0xfc   :  { %1217 = vmatmul.bf16.vlgmr.msrb.gmra.mxu1 %v3208_v17  ;;  %963 = vmatpush.bf16.msra.mxu0 %v1842_v6 }
  0xfd   :  { %1265 = vmatpush.bf16.msra.mxu1 %v1994_v14  ;;  %v2274_v14 = vld [vmem:[%s3508_s9 + $0x154] sm:$0xf0] }
  0xfe   :  { %v2070_v16 = vor.u32 %v2274_v14, %v2069_v13  ;;  %v2297_v13 = vld [vmem:[%s3511_s12 + $0x10] sm:$0xff]  ;;  %v2304_v14 = vld [vmem:[%s3511_s12 + $0x48] sm:$0xff] }
  0xff   :  { %1280 = vmatpush.bf16.msrb.mxu2 %v2042_v50  ;;  %950 = vmatpush.bf16.msra.mxu3 %v1838_v3  ;;  %v2030_v50 = vor.u32 %v2264_v46, %v2029_v45 }
 0x100   :  { %1248 = vmatpush.bf16.msrb.mxu0 %v1962_v8  ;;  %v2309_v8 = vld [vmem:[%s3511_s12 + $0x70] sm:$0xff] }
 0x101   :  { %1266 = vmatpush.bf16.msra.mxu1 %v1986_v28  ;;  %v2270_v28 = vld [vmem:[%s3508_s9 + $0x134] sm:$0xf0] }
 0x102   :  { %v2054_v31 = vor.u32 %v2270_v28, %v2053_v27 }
 0x103   :  { %1281 = vmatpush.bf16.msrb.mxu2 %v2034_v59  ;;  %1235 = vmatpush.bf16.msrb.mxu3 %v2086_v7  ;;  %v2302_v7 = vld [vmem:[%s3511_s12 + $0x38] sm:$0xff] }
 0x105   :  { %1267 = vmatpush.bf16.msra.mxu1 %v1978_v42  ;;  %v2233_v42 = vld [vmem:[%s3508_s9 + $0x14] sm:$0xf] }
 0x106   :  { %1282 = vmatmul.bf16.vlgmr.msrb.gmra.mxu2 %v3306_v5  ;;  %v1914_v47 = vor.u32 %v2233_v42, %v1911_v44 }
 0x107   :  { %1236 = vmatpush.bf16.msrb.mxu3 %v2078_v25  ;;  %v2298_v25 = vld [vmem:[%s3511_s12 + $0x18] sm:$0xff] }
 0x109   :  { %1268 = vmatpush.bf16.msra.mxu1 %v1970_v54 }
 0x10b   :  { %1237 = vmatpush.bf16.msrb.mxu3 %v2070_v16  ;;  %v2303_v16 = vld [vmem:[%s3511_s12 + $0x40] sm:$0xff] }
 0x10c   :  { %1269 = vmatmul.bf16.vlgmr.msra.gmra.mxu1 %v3172_v61  ;;  %v1954_v61 = vor.u32 %v2243_v11, %v1951_v12  ;;  %v2299_v11 = vld [vmem:[%s3511_s12 + $0x20] sm:$0xff]  ;;  %v2306_v12 = vld [vmem:[%s3511_s12 + $0x58] sm:$0xff] }
 0x10e   :  { %1249 = vmatpush.bf16.msrb.mxu0 %v1954_v61  ;;  %v2305_v61 = vld [vmem:[%s3511_s12 + $0x50] sm:$0xff] }
 0x10f   :  { %1238 = vmatpush.bf16.msrb.mxu3 %v2062_v23 }
 0x112   :  { %1250 = vmatpush.bf16.msrb.mxu0 %v1946_v19  ;;  %v2318_v19 = vld [vmem:[%s3513_s14 + $0x38] sm:$0xff] }
 0x113   :  { %1239 = vmatpush.bf16.msrb.mxu3 %v2054_v31  ;;  %1527 = vmatpush.bf16.msrb.mxu1 %v2318_v19 }
 0x116   :  { %1251 = vmatpush.bf16.msrb.mxu0 %v1938_v26  ;;  %v2315_v26 = vld [vmem:[%s3513_s14 + $0x20] sm:$0xff] }
 0x117   :  { %1240 = vmatpush.bf16.msrb.mxu3 %v2046_v38  ;;  %1528 = vmatpush.bf16.msrb.mxu1 %v2317_v21  ;;  %v1289_v38 = vperm.slane %v1287_v29, 0 }
 0x11a   :  { %1252 = vmatpush.bf16.msrb.mxu0 %v1930_v33 }
 0x11b   :  { %1241 = vmatpush.bf16.msrb.mxu3 %v2038_v43  ;;  %1529 = vmatpush.bf16.msrb.mxu1 %v2316_v22 }
 0x11e   :  { %1253 = vmatpush.bf16.msrb.mxu0 %v1922_v40 }
 0x11f   :  { %1242 = vmatpush.bf16.msrb.mxu3 %v2030_v50  ;;  %1530 = vmatpush.bf16.msrb.mxu1 %v2315_v26  ;;  %v2312_v50 = vld [vmem:[%s3513_s14 + $0x8] sm:$0xff] }
 0x122   :  { %1254 = vmatpush.bf16.msrb.mxu0 %v1914_v47 }
 0x123   :  { %1531 = vmatpush.bf16.msrb.mxu1 %v2314_v48 }
 0x126   :  { %1255 = vmatpush.bf16.msrb.mxu0 %v1906_v51  ;;  %v2311_v51 = vld [vmem:[%s3513_s14] sm:$0xff] }
 0x127   :  { %1532 = vmatpush.bf16.msrb.mxu1 %v2313_v49 }
 0x12b   :  { %1533 = vmatpush.bf16.msrb.mxu1 %v2312_v50 }
 0x12f   :  { %1534 = vmatpush.bf16.msrb.mxu1 %v2311_v51 }
 0x169   :  { %v777_v52 = vpop.f32.mrf.mxu1  ;;  %v790_v53 = vpop.f32.mrf.mxu2 }
 0x16a   :  { %v778_v54 = vadd.f32 %v2325_v30, %v777_v52  ;;  %v2322_v30 = vld [vmem:[%s3515_s16 + $0x18] sm:$0xff]  ;;  %v2321_v52 = vld [vmem:[%s3515_s16 + $0x10] sm:$0xff] }
 0x16b   :  { %1585 = vmatpush.bf16.msra.mxu2 %v2322_v30 }
 0x16c   :  { %v791_v55 = vadd.f32 %v790_v53, %v778_v54  ;;  %v2320_v53 = vld [vmem:[%s3515_s16 + $0x8] sm:$0xff] }
 0x16e   :  { %v794_v56 = vmax.f32 %v791_v55, 0.0  ;;  %v2326_v55 = vld [vmem:[%s3512_s13] ss:$0 sm:$0xff] }
 0x16f   :  { %1586 = vmatpush.bf16.msra.mxu2 %v2321_v52 }
 0x170   :  { %v846_v35 = vpack.c.bf16 %v794_v56, %v794_v56 }
 0x171   :  { %v779_v57 = vpop.f32.mrf.mxu1  ;;  %v792_v58 = vpop.f32.mrf.mxu2 }
 0x172   :  { %951 = vmatmul.bf16.vlgmr.msra.gmra.mxu3 %v846_v35  ;;  %964 = vmatmul.bf16.vlgmr.msra.gmra.mxu0 %v846_v35 }
 0x173   :  { %1444 = vmatpush.bf16.msra.mxu0 %v2310_v62  ;;  %1431 = vmatpush.bf16.msra.mxu3 %v2302_v7 }
 0x174   :  { %1587 = vmatpush.bf16.msra.mxu2 %v2320_v53 }
 0x177   :  { %1445 = vmatpush.bf16.msra.mxu0 %v2309_v8  ;;  %1432 = vmatpush.bf16.msra.mxu3 %v2301_v9  ;;  %v2328_v8 = vld [vmem:[%s3516_s17] ss:$0 sm:$0xff] }
 0x179   :  { %v1218_v59 = vpop.f32.mrf.mxu1  ;;  %v1231_v60 = vpop.f32.mrf.mxu2 }
 0x181   :  { %v1220_v63 = vpop.f32.mrf.mxu1  ;;  %v1233_v0 = vpop.f32.mrf.mxu2 }
 0x182   :  { %1243 = vmatmul.bf16.vlgmr.msrb.gmra.mxu3 %v3306_v5  ;;  %1256 = vmatmul.bf16.vlgmr.msrb.gmra.mxu0 %v3208_v17  ;;  %v2308_v17 = vld [vmem:[%s3511_s12 + $0x68] sm:$0xff]  ;;  %v2319_v63 = vld [vmem:[%s3515_s16] sm:$0xff] }
 0x183   :  { %1446 = vmatpush.bf16.msra.mxu0 %v2308_v17  ;;  %v2300_v5 = vld [vmem:[%s3511_s12 + $0x28] sm:$0xff]  ;;  %1588 = vmatpush.bf16.msra.mxu2 %v2319_v63  ;;  %v2327_v0 = vld [vmem:[%s3514_s15] ss:$0 sm:$0xff] }
 0x184   :  { %1433 = vmatpush.bf16.msra.mxu3 %v2300_v5 }
 0x187   :  { %1447 = vmatpush.bf16.msra.mxu0 %v2307_v10 }
 0x188   :  { %1434 = vmatpush.bf16.msra.mxu3 %v2299_v11 }
 0x189   :  { %v1270_v1 = vpop.f32.mrf.mxu1  ;;  %v1283_v3 = vpop.f32.mrf.mxu2 }
 0x18b   :  { %1448 = vmatpush.bf16.msra.mxu0 %v2306_v12 }
 0x18c   :  { %1435 = vmatpush.bf16.msra.mxu3 %v2298_v25 }
 0x18f   :  { %1449 = vmatpush.bf16.msra.mxu0 %v2305_v61 }
 0x190   :  { %1436 = vmatpush.bf16.msra.mxu3 %v2297_v13 }
 0x191   :  { %v1272_v2 = vpop.f32.mrf.mxu1  ;;  %v1285_v6 = vpop.f32.mrf.mxu2 }
 0x193   :  { %1450 = vmatpush.bf16.msra.mxu0 %v2304_v14 }
 0x194   :  { %1437 = vmatpush.bf16.msra.mxu3 %v2296_v15 }
 0x197   :  { %1451 = vmatpush.bf16.msra.mxu0 %v2303_v16 }
 0x198   :  { %1438 = vmatpush.bf16.msra.mxu3 %v2295_v18 }
 0x1ef   :  { %v965_v20 = vpop.f32.mrf.mxu0 }
 0x1f5   :  { %v952_v23 = vpop.f32.mrf.mxu3 }
 0x1f6   :  { %v1219_v31 = vadd.f32 %v1218_v59, %v952_v23 }
 0x1f7   :  { %v967_v24 = vpop.f32.mrf.mxu0 }
 0x1f8   :  { %v1232_v37 = vadd.f32 %v1231_v60, %v1219_v31 }
 0x1fd   :  { %v954_v27 = vpop.f32.mrf.mxu3 }
 0x1ff   :  { %v1257_v28 = vpop.f32.mrf.mxu0 }
 0x200   :  { %v1258_v32 = vadd.f32 %v1257_v28, %v965_v20 }
 0x202   :  { %v1271_v33 = vadd.f32 %v1270_v1, %v1258_v32 }
 0x204   :  { %v1284_v36 = vadd.f32 %v1283_v3, %v1271_v33 }
 0x205   :  { %v1244_v39 = vpop.f32.mrf.mxu3 }
 0x206   :  { %v1245_v40 = vadd.f32 %v1244_v39, %v1232_v37  ;;  %v1294_v4 = vadd.f32 %v1290_v34, %v1284_v36 }
 0x207   :  { %v1259_v41 = vpop.f32.mrf.mxu0 }
 0x208   :  { %v1293_v42 = vadd.f32 %v1289_v38, %v1245_v40  ;;  %v1296_v43 = vmax.f32 %v1294_v4, 0.0 }
 0x20a   :  { %v1295_v44 = vmax.f32 %v1293_v42, 0.0  ;;  %v1298_v45 = vpack.c.bf16 %v1296_v43, %v1296_v43 }
 0x20c   :  { %v1297_v46 = vpack.c.bf16 %v1295_v44, %v1295_v44  ;;  %1452 = vmatmul.bf16.vlgmr.msra.gmra.mxu0 %v1298_v45 }
 0x20d   :  { %v1246_v47 = vpop.f32.mrf.mxu3 }
 0x20e   :  { %1439 = vmatmul.bf16.vlgmr.msra.gmra.mxu3 %v1297_v46 }
 0x289   :  { %v1453_v54 = vpop.f32.mrf.mxu0 }
 0x291   :  { %v1440_v56 = vpop.f32.mrf.mxu3  ;;  %v1455_v35 = vpop.f32.mrf.mxu0 }
 0x292   :  { %v1441_v57 = vadd.f32 %v2326_v55, %v1440_v56 }
 0x294   :  { %v1454_v58 = vadd.f32 %v1453_v54, %v1441_v57 }
 0x296   :  { %v1457_v59 = vmax.f32 %v1454_v58, 0.0 }
 0x298   :  { %v1458_v60 = vpack.c.bf16 %v1457_v59, %v1457_v59 }
 0x299   :  { %v1442_v62 = vpop.f32.mrf.mxu3 }
 0x29a   :  { %1535 = vmatmul.bf16.vlgmr.msrb.gmra.mxu1 %v1458_v60 }
 0x317   :  { %v1536_v1 = vpop.f32.mrf.mxu1 }
 0x318   :  { %v1537_v2 = vadd.f32 %v2327_v0, %v1536_v1 }
 0x31a   :  { %v1540_v3 = vmax.f32 %v1537_v2, 0.0 }
 0x31c   :  { %v1541_v6 = vpack.c.bf16 %v1540_v3, %v1540_v3 }
 0x31e   :  { %2203 = vmatmul.msk.bf16.vlgmr.msra.gmra.mxu2 %vm602_vm2, %v1541_v6 }
 0x31f   :  { %v1538_v7 = vpop.f32.mrf.mxu1 }
 0x3a1   :  { %v1590_v9 = vpop.f32.mrf.mxu2 }
 0x3a2   :  { %v1591_v17 = vadd.f32 %v2328_v8, %v1590_v9 }
 0x3a4   :  { %1595 = vst.msk [vmem:[%s3526_s22] sm:$0xff] %vm1594_vm3, %v1591_v17 }
 0x3a9   :  { %v1592_v5 = vpop.f32.mrf.mxu2 }
 0x3aa   :  { %1600 = vsyncpa [#allocation3], 1 }

</bundles_post_ra>
